<compile_context>
chip_gen: v7x
topology: tpu7x:2x2x1
jax: 0.10.0
libtpu: 0.0.40
codegen_flags: <defaults>
</compile_context>

<pallas_src>
import functools
import math

import jax
import jax.numpy as jnp
from jax.experimental import pallas as pl
from jax.experimental.pallas import tpu as pltpu


def _cross_attention_kernel(pcd_ref, nbr_ref, wq_ref, wkv_ref, out_ref, *,
                            num_heads, head_depth, k_out):
    # pcd_ref : (Cq_in, TN)            point features, channels-first, N on lanes
    # nbr_ref : (K, Ck_in, TN)         neighbor features, one lane-dense slab per slot
    # wq_ref  : (q_out, Cq_in)
    # wkv_ref : (k_out + v_out, Ck_in) fused K/V projection weights
    # out_ref : (v_out, TN)            lane-dense output tile
    K = nbr_ref.shape[0]
    TN = pcd_ref.shape[-1]
    H, D = num_heads, head_depth
    inv_scale = 1.0 / math.sqrt(D)

    # Q projection on the MXU: (q_out, TN), points on lanes.
    q = jnp.dot(wq_ref[...], pcd_ref[...], preferred_element_type=jnp.float32)
    q3 = q.reshape(H, D, TN)                     # sublane-aligned split, free

    # Fused K+V projection per neighbor slot; K is small & static -> unrolled.
    # Everything downstream stays lane-dense on TN.
    e_list = []                                  # each (H, TN)
    v_list = []                                  # each (H, D, TN)
    for kk in range(K):
        kv = jnp.dot(wkv_ref[...], nbr_ref[kk],
                     preferred_element_type=jnp.float32)      # (k_out+v_out, TN)
        k3 = kv[:k_out].reshape(H, D, TN)
        v_list.append(kv[k_out:].reshape(H, D, TN))
        # energy[h, n] = <q[h, :, n], k[h, :, n]> / sqrt(D)  (sublane reduce over D)
        e_list.append(jnp.sum(q3 * k3, axis=1) * inv_scale)   # (H, TN)

    # Softmax over the K neighbor slots; all ops are (H, TN), lane-dense.
    m = e_list[0]
    for kk in range(1, K):
        m = jnp.maximum(m, e_list[kk])
    p_list = [jnp.exp(e - m) for e in e_list]
    l = p_list[0]
    for kk in range(1, K):
        l = l + p_list[kk]
    inv_l = pl.reciprocal(l, approx=True)                      # (H, TN), EUP slot

    # Weighted sum of values over K.
    acc = p_list[0][:, None, :] * v_list[0]
    for kk in range(1, K):
        acc = acc + p_list[kk][:, None, :] * v_list[kk]        # (H, D, TN)
    out = acc * inv_l[:, None, :]

    out_ref[...] = out.reshape(H * D, TN).astype(out_ref.dtype)


def _pick_tile_n(n):
    # Largest lane-dense tile (multiple of 128) that divides N; otherwise take
    # the whole axis (valid per the (8,128)/full-dim rule, just unpipelined).
    for t in (1024, 512, 256, 128):
        if n % t == 0:
            return t
    return n


def cross_attention_pallas(pcd, neighbors, wq, wk, wv, num_heads, *, tile_n=None):
    """pcd: (B, q_in, N); neighbors: (B, k_in, N, K); weights: (out, in, 1, 1).
    Returns (B, v_out, N), matching the PyTorch module's forward output."""
    B, Cq_in, N = pcd.shape
    Bn, Ck_in, Nn, K = neighbors.shape
    assert Bn == B and Nn == N
    q_out, k_out, v_out = wq.shape[0], wk.shape[0], wv.shape[0]
    assert wq.shape[1] == Cq_in and wk.shape[1] == Ck_in and wv.shape[1] == Ck_in
    # Module invariants (needed for the shared head split / energy shape).
    assert q_out == k_out == v_out, "module requires q_out == k_out == v_out"
    assert q_out % num_heads == 0
    D = q_out // num_heads

    if tile_n is None:
        TN = _pick_tile_n(N)
    else:
        TN = tile_n
        if N % TN != 0:
            raise ValueError(f"tile_n={TN} must divide N={N} (no tail handling)")
        if TN % 128 != 0 and TN != N:
            raise ValueError("tile_n must be a multiple of 128 or equal to N")

    # 1x1-conv weights (out, in, 1, 1) -> (out, in); already channels-first so
    # no transpose needed.  Fuse K and V weights into one matrix.
    Wq = wq[:, :, 0, 0]                                             # (q_out, Cq_in)
    Wkv = jnp.concatenate([wk[:, :, 0, 0], wv[:, :, 0, 0]], axis=0)  # (k_out+v_out, Ck_in)

    # Single relayout of the big neighbor tensor: (B, Ck, N, K) -> (B, K, Ck, N)
    # so every neighbor slot is a contiguous, lane-dense (Ck, TN) slab in VMEM.
    # Ideally the producer emits this layout directly so this fuses away.
    nbr = jnp.transpose(neighbors, (0, 3, 1, 2))

    kernel = functools.partial(_cross_attention_kernel,
                               num_heads=num_heads, head_depth=D, k_out=k_out)

    out = pl.pallas_call(
        kernel,
        out_shape=jax.ShapeDtypeStruct((B, v_out, N), jnp.float32),
        grid_spec=pltpu.PrefetchScalarGridSpec(
            num_scalar_prefetch=0,
            grid=(B, N // TN),
            in_specs=[
                pl.BlockSpec((None, Cq_in, TN), lambda b, n: (b, 0, n)),
                pl.BlockSpec((None, K, Ck_in, TN), lambda b, n: (b, 0, 0, n)),
                # Constant index maps: Pallas only re-DMAs a block when its
                # index changes, so the weights are copied once, not per step.
                pl.BlockSpec((q_out, Cq_in), lambda b, n: (0, 0)),
                pl.BlockSpec((k_out + v_out, Ck_in), lambda b, n: (0, 0)),
            ],
            out_specs=pl.BlockSpec((None, v_out, TN), lambda b, n: (b, 0, n)),
        ),
        compiler_params=pltpu.CompilerParams(
            dimension_semantics=("parallel", "parallel"),
            vmem_limit_bytes=32 * 1024 * 1024,
        ),
    )(pcd, nbr, Wq, Wkv)

    return out  # (B, v_out, N) — already in the PyTorch output layout.


def cross_attention_reference(pcd, neighbors, wq, wk, wv, num_heads):
    """Plain-JAX transcription of the PyTorch forward, for validation."""
    B, _, N = pcd.shape
    _, _, _, K = neighbors.shape
    q_out = wq.shape[0]
    H = num_heads
    D = q_out // H
    wq2, wk2, wv2 = wq[:, :, 0, 0], wk[:, :, 0, 0], wv[:, :, 0, 0]

    q = jnp.einsum('bcn,oc->bon', pcd, wq2)                 # (B, q_out, N)
    k = jnp.einsum('bcnk,oc->bonk', neighbors, wk2)         # (B, k_out, N, K)
    v = jnp.einsum('bcnk,oc->bonk', neighbors, wv2)

    qh = q.reshape(B, H, D, N, 1).transpose(0, 1, 3, 4, 2)  # (B,H,N,1,D)
    kh = k.reshape(B, H, D, N, K).transpose(0, 1, 3, 4, 2)  # (B,H,N,K,D)
    vh = v.reshape(B, H, D, N, K).transpose(0, 1, 3, 4, 2)  # (B,H,N,K,D)

    energy = jnp.einsum('bhnod,bhnkd->bhnok', qh, kh) / math.sqrt(D)
    att = jax.nn.softmax(energy, axis=-1)
    x = jnp.einsum('bhnok,bhnkd->bhnod', att, vh)[:, :, :, 0, :]   # (B,H,N,D)
    x = x.transpose(0, 2, 1, 3).reshape(B, N, H * D)
    return jnp.transpose(x, (0, 2, 1))                             # (B, v_out, N)


if __name__ == "__main__":
    # Small shapes consistent with the module (q_in=k_in=v_in, q_out=k_out=v_out,
    # q_out % num_heads == 0).
    B, N, K = 2, 16, 8
    q_in = k_in = v_in = 32
    q_out = k_out = v_out = 32
    num_heads = 4

    key = jax.random.PRNGKey(0)
    kp, kn, kq, kk_, kv_ = jax.random.split(key, 5)
    pcd = jax.random.normal(kp, (B, q_in, N), jnp.float32)
    neighbors = jax.random.normal(kn, (B, k_in, N, K), jnp.float32)

    # Deterministic Conv2d(., ., 1, bias=False) weights, PyTorch shape (out, in, 1, 1).
    def conv_weight(k, out_c, in_c):
        bound = 1.0 / math.sqrt(in_c)
        return jax.random.uniform(k, (out_c, in_c, 1, 1), jnp.float32, -bound, bound)

    wq = conv_weight(kq, q_out, q_in)
    wk = conv_weight(kk_, k_out, k_in)
    wv = conv_weight(kv_, v_out, v_in)

    # TODO(synk): only the 'dot_product' Att_Score_method branch is implemented.
    out = cross_attention_pallas(pcd, neighbors, wq, wk, wv, num_heads)
    out = jax.block_until_ready(out)

    ref = cross_attention_reference(pcd, neighbors, wq, wk, wv, num_heads)
    assert out.shape == (B, v_out, N)
    err = float(jnp.max(jnp.abs(out - ref)))
    assert err < 3e-3, f"Pallas kernel mismatch vs reference: max abs err = {err}"
    print("KERNEL_OK")
</pallas_src>

<mosaic_0001>
module attributes {stable_mosaic.version = 11 : i64} {
  func.func @_cross_attention_kernel(%arg0: i32, %arg1: i32, %arg2: memref<1x32x16xf32, #tpu.memory_space<vmem>>, %arg3: memref<1x8x32x16xf32, #tpu.memory_space<vmem>>, %arg4: memref<32x32xf32, #tpu.memory_space<vmem>>, %arg5: memref<64x32xf32, #tpu.memory_space<vmem>>, %arg6: memref<1x32x16xf32, #tpu.memory_space<vmem>>) attributes {dimension_semantics = [#tpu.dimension_semantics<parallel>, #tpu.dimension_semantics<parallel>], iteration_bounds = array<i64: 2, 1>, scalar_prefetch = 0 : i64, scratch_operands = 0 : i64, tpu.core_type = #tpu.core_type<tc>, window_params = [{transform_indices = @transform_0, window_bounds = array<i64: 1, 32, 16>}, {transform_indices = @transform_1, window_bounds = array<i64: 1, 8, 32, 16>}, {pipeline_mode = #tpu.pipeline_mode<synchronous>, transform_indices = @transform_2, window_bounds = array<i64: 32, 32>}, {pipeline_mode = #tpu.pipeline_mode<synchronous>, transform_indices = @transform_3, window_bounds = array<i64: 64, 32>}, {transform_indices = @transform_4, window_bounds = array<i64: 1, 32, 16>}]} {
    %c0 = arith.constant 0 : index
    %c0_0 = arith.constant 0 : index
    %0 = vector.load %arg4[%c0, %c0_0] : memref<32x32xf32, #tpu.memory_space<vmem>>, vector<32x32xf32>
    %c0_1 = arith.constant 0 : index
    %c0_2 = arith.constant 0 : index
    %c0_3 = arith.constant 0 : index
    %1 = vector.load %arg2[%c0_1, %c0_2, %c0_3] : memref<1x32x16xf32, #tpu.memory_space<vmem>>, vector<1x32x16xf32>
    %2 = vector.shape_cast %1 : vector<1x32x16xf32> to vector<32x16xf32>
    %cst = arith.constant dense<0.000000e+00> : vector<32x16xf32>
    %3 = tpu.matmul %0, %2, %cst {dimension_numbers = #tpu.dot_dimension_numbers<[1], [0], [0], [1], [0, 0, 1, 1], [], []>} : vector<32x32xf32>, vector<32x16xf32>, vector<32x16xf32> -> vector<32x16xf32>
    %4 = vector.shape_cast %3 : vector<32x16xf32> to vector<4x8x16xf32>
    %c0_4 = arith.constant 0 : index
    %c0_5 = arith.constant 0 : index
    %5 = vector.load %arg5[%c0_4, %c0_5] : memref<64x32xf32, #tpu.memory_space<vmem>>, vector<64x32xf32>
    %c0_6 = arith.constant 0 : index
    %c0_7 = arith.constant 0 : index
    %c0_8 = arith.constant 0 : index
    %c0_9 = arith.constant 0 : index
    %6 = vector.load %arg3[%c0_6, %c0_7, %c0_8, %c0_9] : memref<1x8x32x16xf32, #tpu.memory_space<vmem>>, vector<1x1x32x16xf32>
    %7 = vector.shape_cast %6 : vector<1x1x32x16xf32> to vector<32x16xf32>
    %cst_10 = arith.constant dense<0.000000e+00> : vector<64x16xf32>
    %8 = tpu.matmul %5, %7, %cst_10 {dimension_numbers = #tpu.dot_dimension_numbers<[1], [0], [0], [1], [0, 0, 1, 1], [], []>} : vector<64x32xf32>, vector<32x16xf32>, vector<64x16xf32> -> vector<64x16xf32>
    %9 = vector.extract_strided_slice %8 {offsets = [0, 0], sizes = [32, 16], strides = [1, 1]} : vector<64x16xf32> to vector<32x16xf32>
    %10 = vector.shape_cast %9 : vector<32x16xf32> to vector<4x8x16xf32>
    %11 = vector.extract_strided_slice %8 {offsets = [32, 0], sizes = [32, 16], strides = [1, 1]} : vector<64x16xf32> to vector<32x16xf32>
    %12 = vector.shape_cast %11 : vector<32x16xf32> to vector<4x8x16xf32>
    %13 = arith.mulf %4, %10 : vector<4x8x16xf32>
    %cst_11 = arith.constant dense<0.000000e+00> : vector<4x16xf32>
    %14 = vector.multi_reduction <add>, %13, %cst_11 [1] : vector<4x8x16xf32> to vector<4x16xf32>
    %cst_12 = arith.constant 0.353553385 : f32
    %15 = vector.broadcast %cst_12 : f32 to vector<4x16xf32>
    %16 = arith.mulf %14, %15 : vector<4x16xf32>
    %c0_13 = arith.constant 0 : index
    %c0_14 = arith.constant 0 : index
    %17 = vector.load %arg5[%c0_13, %c0_14] : memref<64x32xf32, #tpu.memory_space<vmem>>, vector<64x32xf32>
    %c0_15 = arith.constant 0 : index
    %c1 = arith.constant 1 : index
    %c0_16 = arith.constant 0 : index
    %c0_17 = arith.constant 0 : index
    %18 = vector.load %arg3[%c0_15, %c1, %c0_16, %c0_17] : memref<1x8x32x16xf32, #tpu.memory_space<vmem>>, vector<1x1x32x16xf32>
    %19 = vector.shape_cast %18 : vector<1x1x32x16xf32> to vector<32x16xf32>
    %cst_18 = arith.constant dense<0.000000e+00> : vector<64x16xf32>
    %20 = tpu.matmul %17, %19, %cst_18 {dimension_numbers = #tpu.dot_dimension_numbers<[1], [0], [0], [1], [0, 0, 1, 1], [], []>} : vector<64x32xf32>, vector<32x16xf32>, vector<64x16xf32> -> vector<64x16xf32>
    %21 = vector.extract_strided_slice %20 {offsets = [0, 0], sizes = [32, 16], strides = [1, 1]} : vector<64x16xf32> to vector<32x16xf32>
    %22 = vector.shape_cast %21 : vector<32x16xf32> to vector<4x8x16xf32>
    %23 = vector.extract_strided_slice %20 {offsets = [32, 0], sizes = [32, 16], strides = [1, 1]} : vector<64x16xf32> to vector<32x16xf32>
    %24 = vector.shape_cast %23 : vector<32x16xf32> to vector<4x8x16xf32>
    %25 = arith.mulf %4, %22 : vector<4x8x16xf32>
    %cst_19 = arith.constant dense<0.000000e+00> : vector<4x16xf32>
    %26 = vector.multi_reduction <add>, %25, %cst_19 [1] : vector<4x8x16xf32> to vector<4x16xf32>
    %cst_20 = arith.constant 0.353553385 : f32
    %27 = vector.broadcast %cst_20 : f32 to vector<4x16xf32>
    %28 = arith.mulf %26, %27 : vector<4x16xf32>
    %c0_21 = arith.constant 0 : index
    %c0_22 = arith.constant 0 : index
    %29 = vector.load %arg5[%c0_21, %c0_22] : memref<64x32xf32, #tpu.memory_space<vmem>>, vector<64x32xf32>
    %c0_23 = arith.constant 0 : index
    %c2 = arith.constant 2 : index
    %c0_24 = arith.constant 0 : index
    %c0_25 = arith.constant 0 : index
    %30 = vector.load %arg3[%c0_23, %c2, %c0_24, %c0_25] : memref<1x8x32x16xf32, #tpu.memory_space<vmem>>, vector<1x1x32x16xf32>
    %31 = vector.shape_cast %30 : vector<1x1x32x16xf32> to vector<32x16xf32>
    %cst_26 = arith.constant dense<0.000000e+00> : vector<64x16xf32>
    %32 = tpu.matmul %29, %31, %cst_26 {dimension_numbers = #tpu.dot_dimension_numbers<[1], [0], [0], [1], [0, 0, 1, 1], [], []>} : vector<64x32xf32>, vector<32x16xf32>, vector<64x16xf32> -> vector<64x16xf32>
    %33 = vector.extract_strided_slice %32 {offsets = [0, 0], sizes = [32, 16], strides = [1, 1]} : vector<64x16xf32> to vector<32x16xf32>
    %34 = vector.shape_cast %33 : vector<32x16xf32> to vector<4x8x16xf32>
    %35 = vector.extract_strided_slice %32 {offsets = [32, 0], sizes = [32, 16], strides = [1, 1]} : vector<64x16xf32> to vector<32x16xf32>
    %36 = vector.shape_cast %35 : vector<32x16xf32> to vector<4x8x16xf32>
    %37 = arith.mulf %4, %34 : vector<4x8x16xf32>
    %cst_27 = arith.constant dense<0.000000e+00> : vector<4x16xf32>
    %38 = vector.multi_reduction <add>, %37, %cst_27 [1] : vector<4x8x16xf32> to vector<4x16xf32>
    %cst_28 = arith.constant 0.353553385 : f32
    %39 = vector.broadcast %cst_28 : f32 to vector<4x16xf32>
    %40 = arith.mulf %38, %39 : vector<4x16xf32>
    %c0_29 = arith.constant 0 : index
    %c0_30 = arith.constant 0 : index
    %41 = vector.load %arg5[%c0_29, %c0_30] : memref<64x32xf32, #tpu.memory_space<vmem>>, vector<64x32xf32>
    %c0_31 = arith.constant 0 : index
    %c3 = arith.constant 3 : index
    %c0_32 = arith.constant 0 : index
    %c0_33 = arith.constant 0 : index
    %42 = vector.load %arg3[%c0_31, %c3, %c0_32, %c0_33] : memref<1x8x32x16xf32, #tpu.memory_space<vmem>>, vector<1x1x32x16xf32>
    %43 = vector.shape_cast %42 : vector<1x1x32x16xf32> to vector<32x16xf32>
    %cst_34 = arith.constant dense<0.000000e+00> : vector<64x16xf32>
    %44 = tpu.matmul %41, %43, %cst_34 {dimension_numbers = #tpu.dot_dimension_numbers<[1], [0], [0], [1], [0, 0, 1, 1], [], []>} : vector<64x32xf32>, vector<32x16xf32>, vector<64x16xf32> -> vector<64x16xf32>
    %45 = vector.extract_strided_slice %44 {offsets = [0, 0], sizes = [32, 16], strides = [1, 1]} : vector<64x16xf32> to vector<32x16xf32>
    %46 = vector.shape_cast %45 : vector<32x16xf32> to vector<4x8x16xf32>
    %47 = vector.extract_strided_slice %44 {offsets = [32, 0], sizes = [32, 16], strides = [1, 1]} : vector<64x16xf32> to vector<32x16xf32>
    %48 = vector.shape_cast %47 : vector<32x16xf32> to vector<4x8x16xf32>
    %49 = arith.mulf %4, %46 : vector<4x8x16xf32>
    %cst_35 = arith.constant dense<0.000000e+00> : vector<4x16xf32>
    %50 = vector.multi_reduction <add>, %49, %cst_35 [1] : vector<4x8x16xf32> to vector<4x16xf32>
    %cst_36 = arith.constant 0.353553385 : f32
    %51 = vector.broadcast %cst_36 : f32 to vector<4x16xf32>
    %52 = arith.mulf %50, %51 : vector<4x16xf32>
    %c0_37 = arith.constant 0 : index
    %c0_38 = arith.constant 0 : index
    %53 = vector.load %arg5[%c0_37, %c0_38] : memref<64x32xf32, #tpu.memory_space<vmem>>, vector<64x32xf32>
    %c0_39 = arith.constant 0 : index
    %c4 = arith.constant 4 : index
    %c0_40 = arith.constant 0 : index
    %c0_41 = arith.constant 0 : index
    %54 = vector.load %arg3[%c0_39, %c4, %c0_40, %c0_41] : memref<1x8x32x16xf32, #tpu.memory_space<vmem>>, vector<1x1x32x16xf32>
    %55 = vector.shape_cast %54 : vector<1x1x32x16xf32> to vector<32x16xf32>
    %cst_42 = arith.constant dense<0.000000e+00> : vector<64x16xf32>
    %56 = tpu.matmul %53, %55, %cst_42 {dimension_numbers = #tpu.dot_dimension_numbers<[1], [0], [0], [1], [0, 0, 1, 1], [], []>} : vector<64x32xf32>, vector<32x16xf32>, vector<64x16xf32> -> vector<64x16xf32>
    %57 = vector.extract_strided_slice %56 {offsets = [0, 0], sizes = [32, 16], strides = [1, 1]} : vector<64x16xf32> to vector<32x16xf32>
    %58 = vector.shape_cast %57 : vector<32x16xf32> to vector<4x8x16xf32>
    %59 = vector.extract_strided_slice %56 {offsets = [32, 0], sizes = [32, 16], strides = [1, 1]} : vector<64x16xf32> to vector<32x16xf32>
    %60 = vector.shape_cast %59 : vector<32x16xf32> to vector<4x8x16xf32>
    %61 = arith.mulf %4, %58 : vector<4x8x16xf32>
    %cst_43 = arith.constant dense<0.000000e+00> : vector<4x16xf32>
    %62 = vector.multi_reduction <add>, %61, %cst_43 [1] : vector<4x8x16xf32> to vector<4x16xf32>
    %cst_44 = arith.constant 0.353553385 : f32
    %63 = vector.broadcast %cst_44 : f32 to vector<4x16xf32>
    %64 = arith.mulf %62, %63 : vector<4x16xf32>
    %c0_45 = arith.constant 0 : index
    %c0_46 = arith.constant 0 : index
    %65 = vector.load %arg5[%c0_45, %c0_46] : memref<64x32xf32, #tpu.memory_space<vmem>>, vector<64x32xf32>
    %c0_47 = arith.constant 0 : index
    %c5 = arith.constant 5 : index
    %c0_48 = arith.constant 0 : index
    %c0_49 = arith.constant 0 : index
    %66 = vector.load %arg3[%c0_47, %c5, %c0_48, %c0_49] : memref<1x8x32x16xf32, #tpu.memory_space<vmem>>, vector<1x1x32x16xf32>
    %67 = vector.shape_cast %66 : vector<1x1x32x16xf32> to vector<32x16xf32>
    %cst_50 = arith.constant dense<0.000000e+00> : vector<64x16xf32>
    %68 = tpu.matmul %65, %67, %cst_50 {dimension_numbers = #tpu.dot_dimension_numbers<[1], [0], [0], [1], [0, 0, 1, 1], [], []>} : vector<64x32xf32>, vector<32x16xf32>, vector<64x16xf32> -> vector<64x16xf32>
    %69 = vector.extract_strided_slice %68 {offsets = [0, 0], sizes = [32, 16], strides = [1, 1]} : vector<64x16xf32> to vector<32x16xf32>
    %70 = vector.shape_cast %69 : vector<32x16xf32> to vector<4x8x16xf32>
    %71 = vector.extract_strided_slice %68 {offsets = [32, 0], sizes = [32, 16], strides = [1, 1]} : vector<64x16xf32> to vector<32x16xf32>
    %72 = vector.shape_cast %71 : vector<32x16xf32> to vector<4x8x16xf32>
    %73 = arith.mulf %4, %70 : vector<4x8x16xf32>
    %cst_51 = arith.constant dense<0.000000e+00> : vector<4x16xf32>
    %74 = vector.multi_reduction <add>, %73, %cst_51 [1] : vector<4x8x16xf32> to vector<4x16xf32>
    %cst_52 = arith.constant 0.353553385 : f32
    %75 = vector.broadcast %cst_52 : f32 to vector<4x16xf32>
    %76 = arith.mulf %74, %75 : vector<4x16xf32>
    %c0_53 = arith.constant 0 : index
    %c0_54 = arith.constant 0 : index
    %77 = vector.load %arg5[%c0_53, %c0_54] : memref<64x32xf32, #tpu.memory_space<vmem>>, vector<64x32xf32>
    %c0_55 = arith.constant 0 : index
    %c6 = arith.constant 6 : index
    %c0_56 = arith.constant 0 : index
    %c0_57 = arith.constant 0 : index
    %78 = vector.load %arg3[%c0_55, %c6, %c0_56, %c0_57] : memref<1x8x32x16xf32, #tpu.memory_space<vmem>>, vector<1x1x32x16xf32>
    %79 = vector.shape_cast %78 : vector<1x1x32x16xf32> to vector<32x16xf32>
    %cst_58 = arith.constant dense<0.000000e+00> : vector<64x16xf32>
    %80 = tpu.matmul %77, %79, %cst_58 {dimension_numbers = #tpu.dot_dimension_numbers<[1], [0], [0], [1], [0, 0, 1, 1], [], []>} : vector<64x32xf32>, vector<32x16xf32>, vector<64x16xf32> -> vector<64x16xf32>
    %81 = vector.extract_strided_slice %80 {offsets = [0, 0], sizes = [32, 16], strides = [1, 1]} : vector<64x16xf32> to vector<32x16xf32>
    %82 = vector.shape_cast %81 : vector<32x16xf32> to vector<4x8x16xf32>
    %83 = vector.extract_strided_slice %80 {offsets = [32, 0], sizes = [32, 16], strides = [1, 1]} : vector<64x16xf32> to vector<32x16xf32>
    %84 = vector.shape_cast %83 : vector<32x16xf32> to vector<4x8x16xf32>
    %85 = arith.mulf %4, %82 : vector<4x8x16xf32>
    %cst_59 = arith.constant dense<0.000000e+00> : vector<4x16xf32>
    %86 = vector.multi_reduction <add>, %85, %cst_59 [1] : vector<4x8x16xf32> to vector<4x16xf32>
    %cst_60 = arith.constant 0.353553385 : f32
    %87 = vector.broadcast %cst_60 : f32 to vector<4x16xf32>
    %88 = arith.mulf %86, %87 : vector<4x16xf32>
    %c0_61 = arith.constant 0 : index
    %c0_62 = arith.constant 0 : index
    %89 = vector.load %arg5[%c0_61, %c0_62] : memref<64x32xf32, #tpu.memory_space<vmem>>, vector<64x32xf32>
    %c0_63 = arith.constant 0 : index
    %c7 = arith.constant 7 : index
    %c0_64 = arith.constant 0 : index
    %c0_65 = arith.constant 0 : index
    %90 = vector.load %arg3[%c0_63, %c7, %c0_64, %c0_65] : memref<1x8x32x16xf32, #tpu.memory_space<vmem>>, vector<1x1x32x16xf32>
    %91 = vector.shape_cast %90 : vector<1x1x32x16xf32> to vector<32x16xf32>
    %cst_66 = arith.constant dense<0.000000e+00> : vector<64x16xf32>
    %92 = tpu.matmul %89, %91, %cst_66 {dimension_numbers = #tpu.dot_dimension_numbers<[1], [0], [0], [1], [0, 0, 1, 1], [], []>} : vector<64x32xf32>, vector<32x16xf32>, vector<64x16xf32> -> vector<64x16xf32>
    %93 = vector.extract_strided_slice %92 {offsets = [0, 0], sizes = [32, 16], strides = [1, 1]} : vector<64x16xf32> to vector<32x16xf32>
    %94 = vector.shape_cast %93 : vector<32x16xf32> to vector<4x8x16xf32>
    %95 = vector.extract_strided_slice %92 {offsets = [32, 0], sizes = [32, 16], strides = [1, 1]} : vector<64x16xf32> to vector<32x16xf32>
    %96 = vector.shape_cast %95 : vector<32x16xf32> to vector<4x8x16xf32>
    %97 = arith.mulf %4, %94 : vector<4x8x16xf32>
    %cst_67 = arith.constant dense<0.000000e+00> : vector<4x16xf32>
    %98 = vector.multi_reduction <add>, %97, %cst_67 [1] : vector<4x8x16xf32> to vector<4x16xf32>
    %cst_68 = arith.constant 0.353553385 : f32
    %99 = vector.broadcast %cst_68 : f32 to vector<4x16xf32>
    %100 = arith.mulf %98, %99 : vector<4x16xf32>
    %101 = arith.maximumf %16, %28 : vector<4x16xf32>
    %102 = arith.maximumf %101, %40 : vector<4x16xf32>
    %103 = arith.maximumf %102, %52 : vector<4x16xf32>
    %104 = arith.maximumf %103, %64 : vector<4x16xf32>
    %105 = arith.maximumf %104, %76 : vector<4x16xf32>
    %106 = arith.maximumf %105, %88 : vector<4x16xf32>
    %107 = arith.maximumf %106, %100 : vector<4x16xf32>
    %108 = arith.subf %16, %107 : vector<4x16xf32>
    %109 = math.exp %108 : vector<4x16xf32>
    %110 = arith.subf %28, %107 : vector<4x16xf32>
    %111 = math.exp %110 : vector<4x16xf32>
    %112 = arith.subf %40, %107 : vector<4x16xf32>
    %113 = math.exp %112 : vector<4x16xf32>
    %114 = arith.subf %52, %107 : vector<4x16xf32>
    %115 = math.exp %114 : vector<4x16xf32>
    %116 = arith.subf %64, %107 : vector<4x16xf32>
    %117 = math.exp %116 : vector<4x16xf32>
    %118 = arith.subf %76, %107 : vector<4x16xf32>
    %119 = math.exp %118 : vector<4x16xf32>
    %120 = arith.subf %88, %107 : vector<4x16xf32>
    %121 = math.exp %120 : vector<4x16xf32>
    %122 = arith.subf %100, %107 : vector<4x16xf32>
    %123 = math.exp %122 : vector<4x16xf32>
    %124 = arith.addf %109, %111 : vector<4x16xf32>
    %125 = arith.addf %124, %113 : vector<4x16xf32>
    %126 = arith.addf %125, %115 : vector<4x16xf32>
    %127 = arith.addf %126, %117 : vector<4x16xf32>
    %128 = arith.addf %127, %119 : vector<4x16xf32>
    %129 = arith.addf %128, %121 : vector<4x16xf32>
    %130 = arith.addf %129, %123 : vector<4x16xf32>
    %131 = tpu.reciprocal %130 {approx = true} : vector<4x16xf32> -> vector<4x16xf32>
    %132 = vector.shape_cast %109 : vector<4x16xf32> to vector<4x1x16xf32>
    %133 = vector.broadcast %132 : vector<4x1x16xf32> to vector<4x8x16xf32>
    %134 = arith.mulf %133, %12 : vector<4x8x16xf32>
    %135 = vector.shape_cast %111 : vector<4x16xf32> to vector<4x1x16xf32>
    %136 = vector.broadcast %135 : vector<4x1x16xf32> to vector<4x8x16xf32>
    %137 = arith.mulf %136, %24 : vector<4x8x16xf32>
    %138 = arith.addf %134, %137 : vector<4x8x16xf32>
    %139 = vector.shape_cast %113 : vector<4x16xf32> to vector<4x1x16xf32>
    %140 = vector.broadcast %139 : vector<4x1x16xf32> to vector<4x8x16xf32>
    %141 = arith.mulf %140, %36 : vector<4x8x16xf32>
    %142 = arith.addf %138, %141 : vector<4x8x16xf32>
    %143 = vector.shape_cast %115 : vector<4x16xf32> to vector<4x1x16xf32>
    %144 = vector.broadcast %143 : vector<4x1x16xf32> to vector<4x8x16xf32>
    %145 = arith.mulf %144, %48 : vector<4x8x16xf32>
    %146 = arith.addf %142, %145 : vector<4x8x16xf32>
    %147 = vector.shape_cast %117 : vector<4x16xf32> to vector<4x1x16xf32>
    %148 = vector.broadcast %147 : vector<4x1x16xf32> to vector<4x8x16xf32>
    %149 = arith.mulf %148, %60 : vector<4x8x16xf32>
    %150 = arith.addf %146, %149 : vector<4x8x16xf32>
    %151 = vector.shape_cast %119 : vector<4x16xf32> to vector<4x1x16xf32>
    %152 = vector.broadcast %151 : vector<4x1x16xf32> to vector<4x8x16xf32>
    %153 = arith.mulf %152, %72 : vector<4x8x16xf32>
    %154 = arith.addf %150, %153 : vector<4x8x16xf32>
    %155 = vector.shape_cast %121 : vector<4x16xf32> to vector<4x1x16xf32>
    %156 = vector.broadcast %155 : vector<4x1x16xf32> to vector<4x8x16xf32>
    %157 = arith.mulf %156, %84 : vector<4x8x16xf32>
    %158 = arith.addf %154, %157 : vector<4x8x16xf32>
    %159 = vector.shape_cast %123 : vector<4x16xf32> to vector<4x1x16xf32>
    %160 = vector.broadcast %159 : vector<4x1x16xf32> to vector<4x8x16xf32>
    %161 = arith.mulf %160, %96 : vector<4x8x16xf32>
    %162 = arith.addf %158, %161 : vector<4x8x16xf32>
    %163 = vector.shape_cast %131 : vector<4x16xf32> to vector<4x1x16xf32>
    %164 = vector.broadcast %163 : vector<4x1x16xf32> to vector<4x8x16xf32>
    %165 = arith.mulf %162, %164 : vector<4x8x16xf32>
    %166 = vector.shape_cast %165 : vector<4x8x16xf32> to vector<32x16xf32>
    %c0_69 = arith.constant 0 : index
    %c0_70 = arith.constant 0 : index
    %c0_71 = arith.constant 0 : index
    %167 = vector.load %arg6[%c0_69, %c0_70, %c0_71] : memref<1x32x16xf32, #tpu.memory_space<vmem>>, vector<1x32x16xf32>
    %168 = vector.shape_cast %167 : vector<1x32x16xf32> to vector<32x16xf32>
    %169 = vector.shape_cast %166 : vector<32x16xf32> to vector<1x32x16xf32>
    tpu.vector_store %arg6[%c0_69, %c0_70, %c0_71], %169 {strides = array<i32>} : memref<1x32x16xf32, #tpu.memory_space<vmem>>, vector<1x32x16xf32>,
    return
  }
  func.func @transform_0(%arg0: i32, %arg1: i32) -> (i32, i32, i32) {
    %c0_i32 = arith.constant 0 : i32
    %c0_i32_0 = arith.constant 0 : i32
    return %arg0, %c0_i32, %arg1 : i32, i32, i32
  }
  func.func @transform_1(%arg0: i32, %arg1: i32) -> (i32, i32, i32, i32) {
    %c0_i32 = arith.constant 0 : i32
    %c0_i32_0 = arith.constant 0 : i32
    %c0_i32_1 = arith.constant 0 : i32
    return %arg0, %c0_i32, %c0_i32_0, %arg1 : i32, i32, i32, i32
  }
  func.func @transform_2(%arg0: i32, %arg1: i32) -> (i32, i32) {
    %c0_i32 = arith.constant 0 : i32
    %c0_i32_0 = arith.constant 0 : i32
    %c0_i32_1 = arith.constant 0 : i32
    return %c0_i32, %c0_i32_0 : i32, i32
  }
  func.func @transform_3(%arg0: i32, %arg1: i32) -> (i32, i32) {
    %c0_i32 = arith.constant 0 : i32
    %c0_i32_0 = arith.constant 0 : i32
    %c0_i32_1 = arith.constant 0 : i32
    return %c0_i32, %c0_i32_0 : i32, i32
  }
  func.func @transform_4(%arg0: i32, %arg1: i32) -> (i32, i32, i32) {
    %c0_i32 = arith.constant 0 : i32
    %c0_i32_0 = arith.constant 0 : i32
    return %arg0, %c0_i32, %arg1 : i32, i32, i32
  }
}

</mosaic_0001>

<bundles_post_ra>
// kernel: tpu_custom_call.1
= control target key start
LH: loop header
LB: loop body
LE: loop exit
PB: predicated region body
PF: predicated region fallthrough
CT: control target
= control target key end

     0   :  { %s2502_s15 = smov 0   ;;  %s2504_s16 = smov 0   ;;  %s3120_s0 = inlined_call_operand.vmem [shape: f32[2,32,16], index: 0, kind: input, shape index: {}]   ;;  %s3121_s1 = inlined_call_operand.vmem [shape: f32[2,8,32,16], index: 1, kind: input, shape index: {}]   ;;  %s3122_s2 = inlined_call_operand.vmem [shape: f32[32,32], index: 2, kind: input, shape index: {}]   ;;  %s3123_s3 = inlined_call_operand.vmem [shape: f32[64,32], index: 3, kind: input, shape index: {}]   ;;  %s3124_s4 = inlined_call_operand.vmem [shape: f32[2,32,16], index: 4, kind: output, shape index: {}]  }
   0x1   :  { %s2506_s17 = smov 0  }
   0x2 LB: > { %s26_s18 = sadd.s32 1, %s2471_s16  ;;  %p1895_p0 = scmp.ge.s32.totalorder %s2475_s17, 1  ;;  %s2475_s17 = sphi %s2506_s17, %s14_s17   ;;  %s2471_s16 = sphi %s2504_s16, %s3176_s16   ;;  %s2467_s15 = sphi %s2502_s15, %s3175_s15  }
   0x3   : > { %p28_p1 = scmp.ge.s32.totalorder %s26_s18, 2  ;;  %p196_p2 = scmp.lt.s32.totalorder %s2475_s17, 3 }
   0x5   : > { %s3178_s18 = smov (%p28_p1, %s26_s18), 0  ;;  %p197_p3 = pnand %p1895_p0, %p196_p2 }
   0x7   : > { %200 = sbr.rel (%p197_p3) target bundleno = 398 (0x18e), region = 36 }
   0xe   : > { %p236_p4 = scmp.lt.s32.totalorder %s2467_s15, 1  ;;  %v260_v0 = vld [vmem:[%s3122_s2] sm:$0xff]  ;;  %vm268_vm0 = vcmask 261120   ;;  %v261_v22 = vld [vmem:[%s3122_s2 + $0x8] sm:$0xff]  ;;  %v262_v26 = vld [vmem:[%s3122_s2 + $0x10] sm:$0xff]  ;;  %vm511_vm1 = vcmask 130048  }
   0xf   : > { %v2526_v1 = vld [vmem:[%s3123_s3] sm:$0xff]  ;;  %2115 = vmatprep.mubr.msk.f32.mxu0 %vm268_vm0, %v260_v0  ;;  %v2563_v25 = vld [vmem:[%s3123_s3 + $0x8] sm:$0xff]  ;;  %v2571_v27 = vld [vmem:[%s3123_s3 + $0x10] sm:$0xff] }
  0x10   : > { %2129 = vmatprep.mubr.msk.f32.mxu1 %vm268_vm0, %v2526_v1  ;;  %s3180_s15 = smov (!%p236_p4, %s2467_s15), 1  ;;  %v263_v32 = vld [vmem:[%s3122_s2 + $0x18] sm:$0xff]  ;;  %v2594_v36 = vld [vmem:[%s3123_s3 + $0x20] sm:$0xff]  ;;  %v2608_v41 = vld [vmem:[%s3123_s3 + $0x28] sm:$0xff] }
  0x11   : > { %s2000_s23 = sshll.u32 %s3180_s15, 5  ;;  %s2001_s24 = sshll.u32 %s3180_s15, 8  ;;  %v2589_v35 = vld [vmem:[%s3123_s3 + $0x18] sm:$0xff]  ;;  %v2613_v42 = vld [vmem:[%s3123_s3 + $0x30] sm:$0xff] }
  0x12   : > { %s243_s27 = scalar_lea.vmem %s3120_s0, %s2000_s23  ;;  %s2543_s30 = scalar_lea.vmem %s3121_s1, %s2001_s24  ;;  %v2628_v46 = vld [vmem:[%s3123_s3 + $0x38] sm:$0xff] }
  0x13   : > { %v264_v2 = vld [vmem:[%s243_s27] sm:$0xff]  ;;  %v265_v3 = vld [vmem:[%s243_s27 + $0x8] sm:$0xff]  ;;  %v266_v7 = vld [vmem:[%s243_s27 + $0x10] sm:$0xff]  ;;  %s3094_s6 = scalar_lea.vmem %s3124_s4, %s2000_s23 }
  0x14   : > { %v374_v4 = vld [vmem:[%s2543_s30] sm:$0xff]  ;;  %v2281_v5 = vpack.c.bf16 %v265_v3, %v264_v2  ;;  %v375_v6 = vld [vmem:[%s2543_s30 + $0x8] sm:$0xff]  ;;  %v267_v8 = vld [vmem:[%s243_s27 + $0x18] sm:$0xff] }
  0x15   : > { %v2289_v9 = vpack.c.bf16 %v375_v6, %v374_v4  ;;  %v2285_v10 = vpack.c.bf16 %v267_v8, %v266_v7  ;;  %v376_v11 = vld [vmem:[%s2543_s30 + $0x10] sm:$0xff]  ;;  %v377_v12 = vld [vmem:[%s2543_s30 + $0x18] sm:$0xff]  ;;  %v1914_v13 = vld [vmem:[%s2543_s30 + $0x20] sm:$0xff] }
  0x16   : > { %2282 = vmatprep.subr.bf16.mxu0 %v2281_v5  ;;  %v2293_v14 = vpack.c.bf16 %v377_v12, %v376_v11  ;;  %v1915_v15 = vld [vmem:[%s2543_s30 + $0x28] sm:$0xff]  ;;  %v1926_v16 = vld [vmem:[%s2543_s30 + $0x40] sm:$0xff]  ;;  %v1916_v20 = vld [vmem:[%s2543_s30 + $0x30] sm:$0xff] }
  0x17   : > { %2290 = vmatprep.subr.bf16.mxu1 %v2289_v9  ;;  %2284 = vmatpush3.bf16.msra.mxu0 %v2281_v5  ;;  %v1927_v17 = vld [vmem:[%s2543_s30 + $0x48] sm:$0xff]  ;;  %v2297_v18 = vpack.c.bf16 %v1915_v15, %v1914_v13  ;;  %v1917_v21 = vld [vmem:[%s2543_s30 + $0x38] sm:$0xff]  ;;  %v1928_v23 = vld [vmem:[%s2543_s30 + $0x50] sm:$0xff] }
  0x18   : > { %2292 = vmatpush3.bf16.msra.mxu1 %v2289_v9  ;;  %2286 = vmatprep.subr.bf16.mxu0 %v2285_v10  ;;  %v2305_v19 = vpack.c.bf16 %v1927_v17, %v1926_v16  ;;  %v1929_v24 = vld [vmem:[%s2543_s30 + $0x58] sm:$0xff]  ;;  %v2301_v28 = vpack.c.bf16 %v1917_v21, %v1916_v20  ;;  %v1938_v29 = vld [vmem:[%s2543_s30 + $0x60] sm:$0xff]  ;;  %v1939_v30 = vld [vmem:[%s2543_s30 + $0x68] sm:$0xff] }
  0x19   : > { %2294 = vmatprep.subr.bf16.mxu1 %v2293_v14  ;;  %v2309_v31 = vpack.c.bf16 %v1929_v24, %v1928_v23  ;;  %v1950_v33 = vld [vmem:[%s2543_s30 + $0x80] sm:$0xff]  ;;  %v1951_v34 = vld [vmem:[%s2543_s30 + $0x88] sm:$0xff]  ;;  %v2313_v37 = vpack.c.bf16 %v1939_v30, %v1938_v29  ;;  %v1940_v38 = vld [vmem:[%s2543_s30 + $0x70] sm:$0xff] }
  0x1a   : > { %v1941_v39 = vld [vmem:[%s2543_s30 + $0x78] sm:$0xff]  ;;  %v2321_v40 = vpack.c.bf16 %v1951_v34, %v1950_v33  ;;  %v1962_v44 = vld [vmem:[%s2543_s30 + $0xa0] sm:$0xff]  ;;  %v1963_v45 = vld [vmem:[%s2543_s30 + $0xa8] sm:$0xff] }
  0x1b   : > { %2288 = vmatpush3.bf16.msra.mxu0 %v2285_v10  ;;  %v2317_v43 = vpack.c.bf16 %v1941_v39, %v1940_v38  ;;  %v2329_v47 = vpack.c.bf16 %v1963_v45, %v1962_v44  ;;  %v1952_v48 = vld [vmem:[%s2543_s30 + $0x90] sm:$0xff]  ;;  %v1953_v49 = vld [vmem:[%s2543_s30 + $0x98] sm:$0xff]  ;;  %v1974_v51 = vld [vmem:[%s2543_s30 + $0xc0] sm:$0xff] }
  0x1c   : > { %2296 = vmatpush3.bf16.msra.mxu1 %v2293_v14  ;;  %2298 = vmatprep.subr.bf16.mxu0 %v2297_v18  ;;  %v2325_v50 = vpack.c.bf16 %v1953_v49, %v1952_v48  ;;  %v1975_v52 = vld [vmem:[%s2543_s30 + $0xc8] sm:$0xff]  ;;  %v1964_v54 = vld [vmem:[%s2543_s30 + $0xb0] sm:$0xff]  ;;  %v1965_v55 = vld [vmem:[%s2543_s30 + $0xb8] sm:$0xff] }
  0x1d   : > { %2306 = vmatprep.subr.bf16.mxu1 %v2305_v19  ;;  %v2337_v53 = vpack.c.bf16 %v1975_v52, %v1974_v51  ;;  %v2333_v56 = vpack.c.bf16 %v1965_v55, %v1964_v54  ;;  %v1986_v57 = vld [vmem:[%s2543_s30 + $0xe0] sm:$0xff]  ;;  %v1987_v58 = vld [vmem:[%s2543_s30 + $0xe8] sm:$0xff]  ;;  %v1976_v60 = vld [vmem:[%s2543_s30 + $0xd0] sm:$0xff] }
  0x1e   : > { %2116 = vmatmul.mubr.msk.f32.vlgmr.msra.gmra.mrb[0].mxu0 %vm268_vm0, %v261_v22  ;;  %v2345_v59 = vpack.c.bf16 %v1987_v58, %v1986_v57  ;;  %v1977_v61 = vld [vmem:[%s2543_s30 + $0xd8] sm:$0xff]  ;;  %v1988_v63 = vld [vmem:[%s2543_s30 + $0xf0] sm:$0xff] }
  0x1f   : > { %2130 = vmatmul.mubr.msk.f32.vlgmr.msra.gmra.mrb[0].mxu1 %vm268_vm0, %v2563_v25  ;;  %2300 = vmatpush3.bf16.msra.mxu0 %v2297_v18  ;;  %v2341_v62 = vpack.c.bf16 %v1977_v61, %v1976_v60  ;;  %v1989_v0 = vld [vmem:[%s2543_s30 + $0xf8] sm:$0xff] }
  0x20   : > { %2118 = vmatprep.mubr.msk.f32.mxu0 %vm268_vm0, %v262_v26  ;;  %2132 = vmatprep.mubr.msk.f32.mxu1 %vm268_vm0, %v2571_v27  ;;  %v2349_v2 = vpack.c.bf16 %v1989_v0, %v1988_v63 }
  0x21   : > { %2302 = vmatprep.subr.bf16.mxu0 %v2301_v28  ;;  %2308 = vmatpush3.bf16.msra.mxu1 %v2305_v19 }
  0x22   : > { %2119 = vmatmul.mubr.msk.f32.gmra.mrb[2].mxu0 %vm268_vm0, %v263_v32  ;;  %2310 = vmatprep.subr.bf16.mxu1 %v2309_v31 }
  0x23   : > { %2133 = vmatmul.mubr.msk.f32.gmra.mrb[2].mxu1 %vm268_vm0, %v2589_v35  ;;  %2304 = vmatpush3.bf16.msra.mxu0 %v2301_v28 }
  0x24   : > { %2135 = vmatprep.mubr.msk.f32.mxu1 %vm268_vm0, %v2594_v36  ;;  %2149 = vmatprep.mubr.msk.f32.mxu0 %vm268_vm0, %v2526_v1 }
  0x25   : > { %2314 = vmatprep.subr.bf16.mxu0 %v2313_v37  ;;  %2312 = vmatpush3.bf16.msra.mxu1 %v2309_v31 }
  0x26   : > { %2150 = vmatmul.mubr.msk.f32.vlgmr.msra.gmra.mrb[4].mxu0 %vm268_vm0, %v2563_v25  ;;  %2322 = vmatprep.subr.bf16.mxu1 %v2321_v40 }
  0x27   : > { %2136 = vmatmul.mubr.msk.f32.gmra.mrb[4].mxu1 %vm268_vm0, %v2608_v41  ;;  %2316 = vmatpush3.bf16.msra.mxu0 %v2313_v37 }
  0x28   : > { %2138 = vmatprep.mubr.msk.f32.mxu1 %vm268_vm0, %v2613_v42  ;;  %2152 = vmatprep.mubr.msk.f32.mxu0 %vm268_vm0, %v2571_v27 }
  0x29   : > { %2318 = vmatprep.subr.bf16.mxu0 %v2317_v43 }
  0x2a   : > { %2153 = vmatmul.mubr.msk.f32.gmra.mrb[6].mxu0 %vm268_vm0, %v2589_v35 }
  0x2b   : > { %2139 = vmatmul.mubr.msk.f32.gmra.mrb[6].mxu1 %vm268_vm0, %v2628_v46  ;;  %2155 = vmatprep.mubr.msk.f32.mxu0 %vm268_vm0, %v2594_v36 }
  0x2c   : > { %2169 = vmatprep.mubr.msk.f32.mxu1 %vm268_vm0, %v2526_v1  ;;  %2320 = vmatpush3.bf16.msra.mxu0 %v2317_v43 }
  0x2d   : > { %2330 = vmatprep.subr.bf16.mxu0 %v2329_v47 }
  0x2e   : > { %2156 = vmatmul.mubr.msk.f32.gmra.mrb[8].mxu0 %vm268_vm0, %v2608_v41 }
  0x2f   : > { %2170 = vmatmul.mubr.msk.f32.vlgmr.msra.gmra.mrb[8].mxu1 %vm268_vm0, %v2563_v25  ;;  %2158 = vmatprep.mubr.msk.f32.mxu0 %vm268_vm0, %v2613_v42 }
  0x30   : > { %2172 = vmatprep.mubr.msk.f32.mxu1 %vm268_vm0, %v2571_v27  ;;  %2324 = vmatpush3.bf16.msra.mxu1 %v2321_v40 }
  0x31   : > { %2326 = vmatprep.subr.bf16.mxu1 %v2325_v50 }
  0x32   : > { %2159 = vmatmul.mubr.msk.f32.gmra.mrb[10].mxu0 %vm268_vm0, %v2628_v46 }
  0x33   : > { %2173 = vmatmul.mubr.msk.f32.gmra.mrb[10].mxu1 %vm268_vm0, %v2589_v35  ;;  %2189 = vmatprep.mubr.msk.f32.mxu0 %vm268_vm0, %v2526_v1 }
  0x34   : > { %2175 = vmatprep.mubr.msk.f32.mxu1 %vm268_vm0, %v2594_v36  ;;  %2328 = vmatpush3.bf16.msra.mxu1 %v2325_v50 }
  0x35   : > { %2338 = vmatprep.subr.bf16.mxu1 %v2337_v53 }
  0x36   : > { %2190 = vmatmul.mubr.msk.f32.vlgmr.msra.gmra.mrb[12].mxu0 %vm268_vm0, %v2563_v25 }
  0x37   : > { %2176 = vmatmul.mubr.msk.f32.gmra.mrb[12].mxu1 %vm268_vm0, %v2608_v41  ;;  %2332 = vmatpush3.bf16.msra.mxu0 %v2329_v47 }
  0x38   : > { %2178 = vmatprep.mubr.msk.f32.mxu1 %vm268_vm0, %v2613_v42  ;;  %2192 = vmatprep.mubr.msk.f32.mxu0 %vm268_vm0, %v2571_v27 }
  0x39   : > { %2334 = vmatprep.subr.bf16.mxu0 %v2333_v56 }
  0x3a   : > { %2193 = vmatmul.mubr.msk.f32.gmra.mrb[14].mxu0 %vm268_vm0, %v2589_v35 }
  0x3b   : > { %2179 = vmatmul.mubr.msk.f32.gmra.mrb[14].mxu1 %vm268_vm0, %v2628_v46  ;;  %2195 = vmatprep.mubr.msk.f32.mxu0 %vm268_vm0, %v2594_v36 }
  0x3c   : > { %2209 = vmatprep.mubr.msk.f32.mxu1 %vm268_vm0, %v2526_v1  ;;  %2336 = vmatpush3.bf16.msra.mxu0 %v2333_v56 }
  0x3d   : > { %2346 = vmatprep.subr.bf16.mxu0 %v2345_v59 }
  0x3e   : > { %2196 = vmatmul.mubr.msk.f32.gmra.mrb[16].mxu0 %vm268_vm0, %v2608_v41 }
  0x3f   : > { %2210 = vmatmul.mubr.msk.f32.vlgmr.msra.gmra.mrb[16].mxu1 %vm268_vm0, %v2563_v25  ;;  %2198 = vmatprep.mubr.msk.f32.mxu0 %vm268_vm0, %v2613_v42 }
  0x40   : > { %2212 = vmatprep.mubr.msk.f32.mxu1 %vm268_vm0, %v2571_v27  ;;  %2340 = vmatpush3.bf16.msra.mxu1 %v2337_v53 }
  0x41   : > { %2342 = vmatprep.subr.bf16.mxu1 %v2341_v62 }
  0x42   : > { %2199 = vmatmul.mubr.msk.f32.gmra.mrb[18].mxu0 %vm268_vm0, %v2628_v46 }
  0x43   : > { %2213 = vmatmul.mubr.msk.f32.gmra.mrb[18].mxu1 %vm268_vm0, %v2589_v35  ;;  %2229 = vmatprep.mubr.msk.f32.mxu0 %vm268_vm0, %v2526_v1 }
  0x44   : > { %2215 = vmatprep.mubr.msk.f32.mxu1 %vm268_vm0, %v2594_v36  ;;  %2344 = vmatpush3.bf16.msra.mxu1 %v2341_v62 }
  0x45   : > { %2353 = vmatprep.subr.bf16.mxu1 %v2345_v59 }
  0x46   : > { %2230 = vmatmul.mubr.msk.f32.vlgmr.msra.gmra.mrb[20].mxu0 %vm268_vm0, %v2563_v25 }
  0x47   : > { %2216 = vmatmul.mubr.msk.f32.gmra.mrb[20].mxu1 %vm268_vm0, %v2608_v41  ;;  %2348 = vmatpush3.bf16.msra.mxu0 %v2345_v59 }
  0x48   : > { %2218 = vmatprep.mubr.msk.f32.mxu1 %vm268_vm0, %v2613_v42  ;;  %2232 = vmatprep.mubr.msk.f32.mxu0 %vm268_vm0, %v2571_v27 }
  0x49   : > { %2350 = vmatprep.subr.bf16.mxu0 %v2349_v2 }
  0x4a   : > { %2233 = vmatmul.mubr.msk.f32.gmra.mrb[22].mxu0 %vm268_vm0, %v2589_v35 }
  0x4b   : > { %2219 = vmatmul.mubr.msk.f32.gmra.mrb[22].mxu1 %vm268_vm0, %v2628_v46  ;;  %2235 = vmatprep.mubr.msk.f32.mxu0 %vm268_vm0, %v2594_v36 }
  0x4c   : > { %2249 = vmatprep.mubr.msk.f32.mxu1 %vm268_vm0, %v2526_v1  ;;  %2352 = vmatpush3.bf16.msra.mxu0 %v2349_v2 }
  0x4e   : > { %2236 = vmatmul.mubr.msk.f32.gmra.mrb[24].mxu0 %vm268_vm0, %v2608_v41 }
  0x4f   : > { %2250 = vmatmul.mubr.msk.f32.vlgmr.msra.gmra.mrb[24].mxu1 %vm268_vm0, %v2563_v25  ;;  %2238 = vmatprep.mubr.msk.f32.mxu0 %vm268_vm0, %v2613_v42 }
  0x50   : > { %2252 = vmatprep.mubr.msk.f32.mxu1 %vm268_vm0, %v2571_v27  ;;  %2355 = vmatpush3.bf16.msra.mxu1 %v2345_v59 }
  0x51   : > { %2354 = vmatprep.subr.bf16.mxu1 %v2349_v2 }
  0x52   : > { %2239 = vmatmul.mubr.msk.f32.gmra.mrb[26].mxu0 %vm268_vm0, %v2628_v46 }
  0x53   : > { %2253 = vmatmul.mubr.msk.f32.gmra.mrb[26].mxu1 %vm268_vm0, %v2589_v35  ;;  %2269 = vmatprep.mubr.msk.f32.mxu0 %vm268_vm0, %v2526_v1 }
  0x54   : > { %2255 = vmatprep.mubr.msk.f32.mxu1 %vm268_vm0, %v2594_v36  ;;  %2356 = vmatpush3.bf16.msra.mxu1 %v2349_v2 }
  0x56   : > { %2270 = vmatmul.mubr.msk.f32.vlgmr.msra.gmra.mrb[28].mxu0 %vm268_vm0, %v2563_v25 }
  0x57   : > { %2272 = vmatprep.mubr.msk.f32.mxu0 %vm268_vm0, %v2571_v27  ;;  %2256 = vmatmul.mubr.msk.f32.gmra.mrb[28].mxu1 %vm268_vm0, %v2608_v41 }
  0x58   : > { %2258 = vmatprep.mubr.msk.f32.mxu1 %vm268_vm0, %v2613_v42 }
  0x5a   : > { %2273 = vmatmul.mubr.msk.f32.gmra.mrb[30].mxu0 %vm268_vm0, %v2589_v35 }
  0x5b   : > { %2275 = vmatprep.mubr.msk.f32.mxu0 %vm268_vm0, %v2594_v36  ;;  %2259 = vmatmul.mubr.msk.f32.gmra.mrb[30].mxu1 %vm268_vm0, %v2628_v46 }
  0x5c   : > { %2278 = vmatprep.mubr.msk.f32.mxu1 %vm268_vm0, %v2613_v42 }
  0x5e   : > { %2276 = vmatmul.mubr.msk.f32.gmra.mrb[32].mxu0 %vm268_vm0, %v2608_v41 }
  0x5f   : > { %2279 = vmatmul.mubr.msk.f32.vlgmr.msra.gmra.mrb[32].mxu1 %vm268_vm0, %v2628_v46 }
  0xf1   : > { %v2750_v1 = vpop.f32.mrb[0].mxu0 }
  0xf2   : > { %v2131_v3 = vpop.f32.mrb[0].mxu1  ;;  %v2752_v4 = vpop.f32.mrb[1].mxu0 }
  0xf3   : > { %v508_v5 = vmul.f32 %v2131_v3, %v2750_v1  ;;  %v468_v6 = vpop.f32.mrb[1].mxu1 }
  0xf4   : > { %v507_v7 = vmul.f32 %v468_v6, %v2752_v4 }
  0xf5   : > { %v519_v8 = vsel %vm511_vm1, %v508_v5, 0.0  ;;  %v2757_v9 = vpop.f32.mrb[2].mxu0 }
  0xf6   : > { %v520_v10 = vrot.slane %v519_v8, 4  ;;  %v512_v11 = vsel %vm511_vm1, %v507_v7, 0.0  ;;  %v2134_v12 = vpop.f32.mrb[2].mxu1  ;;  %v2760_v13 = vpop.f32.mrb[3].mxu0 }
  0xf7   : > { %v513_v14 = vrot.slane %v512_v11, 4  ;;  %v510_v15 = vmul.f32 %v2134_v12, %v2757_v9  ;;  %v478_v16 = vpop.f32.mrb[3].mxu1 }
  0xf8   : > { %v521_v17 = vadd.f32 %v520_v10, %v519_v8  ;;  %v509_v18 = vmul.f32 %v478_v16, %v2760_v13 }
  0xf9   : > { %v514_v19 = vadd.f32 %v513_v14, %v512_v11  ;;  %v533_v20 = vsel %vm511_vm1, %v510_v15, 0.0  ;;  %v2151_v21 = vpop.f32.mrb[4].mxu0 }
  0xfa   : > { %v522_v22 = vrot.slane %v521_v17, 2  ;;  %v534_v23 = vrot.slane %v533_v20, 4  ;;  %v526_v24 = vsel %vm511_vm1, %v509_v18, 0.0  ;;  %v655_v25 = vmul.f32 %v2151_v21, %v2750_v1  ;;  %v615_v26 = vpop.f32.mrb[5].mxu0  ;;  %v2767_v27 = vpop.f32.mrb[4].mxu1 }
  0xfb   : > { %v515_v28 = vrot.slane %v514_v19, 2  ;;  %v527_v29 = vrot.slane %v526_v24, 4  ;;  %v654_v30 = vmul.f32 %v615_v26, %v2752_v4  ;;  %v2770_v31 = vpop.f32.mrb[5].mxu1 }
  0xfc   : > { %3125 = vst [vmem:[#allocation2_spill] sm:$0xff] %v2770_v31  ;;  %v523_v32 = vadd.f32 %v522_v22, %v521_v17  ;;  %v535_v33 = vadd.f32 %v534_v23, %v533_v20  ;;  %v665_v34 = vsel %vm511_vm1, %v655_v25, 0.0 }
  0xfd   : > { %v516_v35 = vadd.f32 %v515_v28, %v514_v19  ;;  %v528_v36 = vadd.f32 %v527_v29, %v526_v24  ;;  %v666_v37 = vrot.slane %v665_v34, 4  ;;  %v658_v38 = vsel %vm511_vm1, %v654_v30, 0.0  ;;  %v2154_v39 = vpop.f32.mrb[6].mxu0 }
  0xfe   : > { %v524_v40 = vrot.slane %v523_v32, 1  ;;  %v536_v41 = vrot.slane %v535_v33, 2  ;;  %v659_v42 = vrot.slane %v658_v38, 4  ;;  %v657_v43 = vmul.f32 %v2154_v39, %v2757_v9  ;;  %v625_v44 = vpop.f32.mrb[7].mxu0  ;;  %v2775_v45 = vpop.f32.mrb[6].mxu1 }
  0xff   : > { %3126 = vst [vmem:[#allocation3_spill] sm:$0xff] %v2775_v45  ;;  %v517_v46 = vrot.slane %v516_v35, 1  ;;  %v529_v47 = vrot.slane %v528_v36, 2  ;;  %v667_v48 = vadd.f32 %v666_v37, %v665_v34  ;;  %v656_v49 = vmul.f32 %v625_v44, %v2760_v13  ;;  %v2778_v50 = vpop.f32.mrb[7].mxu1 }
 0x100   : > { %3127 = vst [vmem:[#allocation4_spill] sm:$0xff] %v2778_v50  ;;  %v525_v51 = vadd.f32 %v524_v40, %v523_v32  ;;  %v537_v52 = vadd.f32 %v536_v41, %v535_v33  ;;  %v660_v53 = vadd.f32 %v659_v42, %v658_v38  ;;  %v679_v54 = vsel %vm511_vm1, %v657_v43, 0.0 }
 0x101   : > { %v518_v55 = vadd.f32 %v517_v46, %v516_v35  ;;  %v530_v56 = vadd.f32 %v529_v47, %v528_v36  ;;  %v668_v57 = vrot.slane %v667_v48, 2  ;;  %v680_v58 = vrot.slane %v679_v54, 4  ;;  %v2781_v59 = vpop.f32.mrb[8].mxu0 }
 0x102   : > { %v2783_v60 = vmul.f32 0.35355338, %v525_v51  ;;  %v538_v61 = vrot.slane %v537_v52, 1  ;;  %v661_v62 = vrot.slane %v660_v53, 2  ;;  %v672_v63 = vsel %vm511_vm1, %v656_v49, 0.0  ;;  %v2171_v0 = vpop.f32.mrb[8].mxu1 }
 0x103   : > { %v2786_v2 = vmul.f32 0.35355338, %v518_v55  ;;  %v531_v3 = vrot.slane %v530_v56, 1  ;;  %v669_v5 = vadd.f32 %v668_v57, %v667_v48  ;;  %v681_v6 = vadd.f32 %v680_v58, %v679_v54  ;;  %v2788_v7 = vpop.f32.mrb[9].mxu0  ;;  %v761_v8 = vpop.f32.mrb[9].mxu1 }
 0x104   : > { %3128 = vst [vmem:[#allocation5_spill] sm:$0xff] %v2788_v7  ;;  %v539_v10 = vadd.f32 %v538_v61, %v537_v52  ;;  %v662_v11 = vadd.f32 %v661_v62, %v660_v53  ;;  %v673_v12 = vrot.slane %v672_v63, 4  ;;  %v801_v14 = vmul.f32 %v2171_v0, %v2750_v1 }
 0x105   : > { %v532_v15 = vadd.f32 %v531_v3, %v530_v56  ;;  %v670_v16 = vrot.slane %v669_v5, 1  ;;  %v682_v17 = vrot.slane %v681_v6, 2  ;;  %v800_v18 = vmul.f32 %v761_v8, %v2752_v4  ;;  %v2792_v19 = vpop.f32.mrb[10].mxu0 }
 0x106   : > { %3129 = vst [vmem:[#allocation6_spill] sm:$0xff] %v2792_v19  ;;  %v2794_v20 = vmul.f32 0.35355338, %v539_v10  ;;  %v663_v21 = vrot.slane %v662_v11, 1  ;;  %v674_v22 = vadd.f32 %v673_v12, %v672_v63  ;;  %v811_v23 = vsel %vm511_vm1, %v801_v14, 0.0  ;;  %v2174_v24 = vpop.f32.mrb[10].mxu1 }
 0x107   : > { %v2797_v25 = vpop.f32.mrb[11].mxu0  ;;  %v2799_v26 = vmul.f32 0.35355338, %v532_v15  ;;  %v671_v28 = vadd.f32 %v670_v16, %v669_v5  ;;  %v683_v29 = vadd.f32 %v682_v17, %v681_v6  ;;  %v812_v30 = vrot.slane %v811_v23, 4  ;;  %v771_v32 = vpop.f32.mrb[11].mxu1 }
 0x108   : > { %3130 = vst [vmem:[#allocation7_spill] sm:$0xff] %v2797_v25  ;;  %v664_v33 = vadd.f32 %v663_v21, %v662_v11  ;;  %v675_v34 = vrot.slane %v674_v22, 2  ;;  %v804_v35 = vsel %vm511_vm1, %v800_v18, 0.0  ;;  %v803_v36 = vmul.f32 %v2174_v24, %v2757_v9 }
 0x109   : > { %v2803_v37 = vmul.f32 0.35355338, %v671_v28  ;;  %v684_v38 = vrot.slane %v683_v29, 1  ;;  %v813_v39 = vadd.f32 %v812_v30, %v811_v23  ;;  %v805_v40 = vrot.slane %v804_v35, 4  ;;  %v2191_v41 = vpop.f32.mrb[12].mxu0 }
 0x10a   : > { %v2805_v42 = vmul.f32 0.35355338, %v664_v33  ;;  %v676_v43 = vadd.f32 %v675_v34, %v674_v22  ;;  %v825_v44 = vsel %vm511_vm1, %v803_v36, 0.0  ;;  %v802_v46 = vmul.f32 %v771_v32, %v2760_v13  ;;  %v907_v47 = vpop.f32.mrb[13].mxu0  ;;  %v2809_v48 = vpop.f32.mrb[12].mxu1 }
 0x10b   : > { %v1567_v49 = vmax.f32 %v2783_v60, %v2803_v37  ;;  %v685_v51 = vadd.f32 %v684_v38, %v683_v29  ;;  %v814_v52 = vrot.slane %v813_v39, 2  ;;  %v806_v53 = vadd.f32 %v805_v40, %v804_v35  ;;  %v2813_v54 = vpop.f32.mrb[13].mxu1 }
 0x10c   : > { %3131 = vst [vmem:[#allocation8_spill] sm:$0xff] %v2813_v54  ;;  %v1566_v55 = vmax.f32 %v2786_v2, %v2805_v42  ;;  %v677_v56 = vrot.slane %v676_v43, 1  ;;  %v826_v57 = vrot.slane %v825_v44, 4  ;;  %v818_v58 = vsel %vm511_vm1, %v802_v46, 0.0 }
 0x10d   : > { %v2818_v61 = vmul.f32 0.35355338, %v685_v51  ;;  %v815_v62 = vadd.f32 %v814_v52, %v813_v39  ;;  %v807_v63 = vrot.slane %v806_v53, 2  ;;  %v819_v0 = vrot.slane %v818_v58, 4  ;;  %v2194_v3 = vpop.f32.mrb[14].mxu0 }
 0x10e   : > { %v678_v5 = vadd.f32 %v677_v56, %v676_v43  ;;  %v827_v6 = vadd.f32 %v826_v57, %v825_v44  ;;  %v947_v8 = vmul.f32 %v2191_v41, %v2750_v1  ;;  %v946_v10 = vmul.f32 %v907_v47, %v2752_v4  ;;  %v917_v11 = vpop.f32.mrb[15].mxu0  ;;  %v2822_v12 = vpop.f32.mrb[14].mxu1 }
 0x10f   : > { %3132 = vst [vmem:[#allocation9_spill] sm:$0xff] %v2822_v12  ;;  %v1569_v14 = vmax.f32 %v2794_v20, %v2818_v61  ;;  %v816_v15 = vrot.slane %v815_v62, 1  ;;  %v808_v16 = vadd.f32 %v807_v63, %v806_v53  ;;  %v820_v17 = vadd.f32 %v819_v0, %v818_v58  ;;  %v2826_v18 = vpop.f32.mrb[15].mxu1 }
 0x110   : > { %3133 = vst [vmem:[#allocation10_spill] sm:$0xff] %v2826_v18  ;;  %v2828_v21 = vmul.f32 0.35355338, %v678_v5  ;;  %v828_v22 = vrot.slane %v827_v6, 2  ;;  %v957_v23 = vsel %vm511_vm1, %v947_v8, 0.0  ;;  %v950_v24 = vsel %vm511_vm1, %v946_v10, 0.0 }
 0x111   : > { %v817_v28 = vadd.f32 %v816_v15, %v815_v62  ;;  %v809_v29 = vrot.slane %v808_v16, 1  ;;  %v821_v30 = vrot.slane %v820_v17, 2  ;;  %v958_v32 = vrot.slane %v957_v23, 4  ;;  %v2832_v33 = vpop.f32.mrb[16].mxu0 }
 0x112   : > { %v1568_v34 = vmax.f32 %v2799_v26, %v2828_v21  ;;  %v829_v35 = vadd.f32 %v828_v22, %v827_v6  ;;  %v951_v36 = vrot.slane %v950_v24, 4  ;;  %v949_v38 = vmul.f32 %v2194_v3, %v2757_v9  ;;  %v2211_v39 = vpop.f32.mrb[16].mxu1  ;;  %v2837_v40 = vpop.f32.mrb[17].mxu0 }
 0x113   : > { %3134 = vst [vmem:[#allocation11_spill] sm:$0xff] %v2837_v40  ;;  %v2839_v41 = vmul.f32 0.35355338, %v817_v28  ;;  %v810_v43 = vadd.f32 %v809_v29, %v808_v16  ;;  %v822_v44 = vadd.f32 %v821_v30, %v820_v17  ;;  %v959_v46 = vadd.f32 %v958_v32, %v957_v23  ;;  %v1053_v47 = vpop.f32.mrb[17].mxu1 }
 0x114   : > { %v830_v51 = vrot.slane %v829_v35, 1  ;;  %v952_v52 = vadd.f32 %v951_v36, %v950_v24  ;;  %v971_v53 = vsel %vm511_vm1, %v949_v38, 0.0  ;;  %v948_v56 = vmul.f32 %v917_v11, %v2760_v13 }
 0x115   : > { %v2844_v57 = vmax.f32 %v1567_v49, %v2839_v41  ;;  %v2846_v58 = vmul.f32 0.35355338, %v810_v43  ;;  %v823_v62 = vrot.slane %v822_v44, 1  ;;  %v960_v63 = vrot.slane %v959_v46, 2  ;;  %v2848_v0 = vpop.f32.mrb[18].mxu0 }
 0x116   : > { %3135 = vst [vmem:[#allocation12_spill] sm:$0xff] %v2848_v0  ;;  %v831_v3 = vadd.f32 %v830_v51, %v829_v35  ;;  %v953_v5 = vrot.slane %v952_v52, 2  ;;  %v972_v6 = vrot.slane %v971_v53, 4  ;;  %v964_v8 = vsel %vm511_vm1, %v948_v56, 0.0  ;;  %v2214_v10 = vpop.f32.mrb[18].mxu1  ;;  %v2851_v15 = vpop.f32.mrb[19].mxu0 }
 0x117   : > { %3136 = vst [vmem:[#allocation13_spill] sm:$0xff] %v2851_v15  ;;  %v2854_v16 = vmax.f32 %v1566_v55, %v2846_v58  ;;  %v824_v11 = vadd.f32 %v823_v62, %v822_v44  ;;  %v961_v49 = vadd.f32 %v960_v63, %v959_v46  ;;  %v965_v17 = vrot.slane %v964_v8, 4  ;;  %v1063_v22 = vpop.f32.mrb[19].mxu1 }
 0x118   : > { %v2856_v23 = vmul.f32 0.35355338, %v831_v3  ;;  %v954_v24 = vadd.f32 %v953_v5, %v952_v52  ;;  %v973_v28 = vadd.f32 %v972_v6, %v971_v53  ;;  %v1093_v29 = vmul.f32 %v2211_v39, %v2750_v1 }
 0x119   : > { %v2859_v30 = vmul.f32 0.35355338, %v824_v11  ;;  %v962_v32 = vrot.slane %v961_v49, 1  ;;  %v966_v35 = vadd.f32 %v965_v17, %v964_v8  ;;  %v1092_v36 = vmul.f32 %v1053_v47, %v2752_v4  ;;  %v2231_v38 = vpop.f32.mrb[20].mxu0 }
 0x11a   : > { %v2863_v55 = vmax.f32 %v1569_v14, %v2856_v23  ;;  %v955_v43 = vrot.slane %v954_v24, 1  ;;  %v974_v44 = vrot.slane %v973_v28, 2  ;;  %v1103_v46 = vsel %vm511_vm1, %v1093_v29, 0.0  ;;  %v1199_v51 = vpop.f32.mrb[21].mxu0  ;;  %v2866_v56 = vpop.f32.mrb[20].mxu1 }
 0x11b   : > { %v2869_v52 = vmax.f32 %v1568_v34, %v2859_v30  ;;  %v963_v39 = vadd.f32 %v962_v32, %v961_v49  ;;  %v967_v53 = vrot.slane %v966_v35, 2  ;;  %v1104_v62 = vrot.slane %v1103_v46, 4  ;;  %v2871_v63 = vpop.f32.mrb[21].mxu1 }
 0x11c   : > { %3137 = vst [vmem:[#allocation14_spill] sm:$0xff] %v2871_v63  ;;  %v956_v47 = vadd.f32 %v955_v43, %v954_v24  ;;  %v975_v3 = vadd.f32 %v974_v44, %v973_v28  ;;  %v1096_v14 = vsel %vm511_vm1, %v1092_v36, 0.0  ;;  %v1095_v5 = vmul.f32 %v2214_v10, %v2757_v9 }
 0x11d   : > { %v2875_v6 = vmul.f32 0.35355338, %v963_v39  ;;  %v968_v8 = vadd.f32 %v967_v53, %v966_v35  ;;  %v1105_v11 = vadd.f32 %v1104_v62, %v1103_v46  ;;  %v1097_v17 = vrot.slane %v1096_v14, 4  ;;  %v2234_v29 = vpop.f32.mrb[22].mxu0 }
 0x11e   : > { %v2877_v15 = vmul.f32 0.35355338, %v956_v47  ;;  %v976_v34 = vrot.slane %v975_v3, 1  ;;  %v1117_v49 = vsel %vm511_vm1, %v1095_v5, 0.0  ;;  %v1094_v32 = vmul.f32 %v1063_v22, %v2760_v13  ;;  %v1209_v18 = vpop.f32.mrb[23].mxu0  ;;  %v2881_v24 = vpop.f32.mrb[22].mxu1 }
 0x11f   : > { %3138 = vst [vmem:[#allocation15_spill] sm:$0xff] %v2881_v24  ;;  %v1575_v28 = vmax.f32 %v2844_v57, %v2875_v6  ;;  %v969_v10 = vrot.slane %v968_v8, 1  ;;  %v1106_v36 = vrot.slane %v1105_v11, 2  ;;  %v1098_v43 = vadd.f32 %v1097_v17, %v1096_v14  ;;  %v2885_v35 = vpop.f32.mrb[23].mxu1 }
 0x120   : > { %3139 = vst [vmem:[#allocation16_spill] sm:$0xff] %v2885_v35  ;;  %v1574_v44 = vmax.f32 %v2854_v16, %v2877_v15  ;;  %v977_v46 = vadd.f32 %v976_v34, %v975_v3  ;;  %v1118_v39 = vrot.slane %v1117_v49, 4  ;;  %v1110_v53 = vsel %vm511_vm1, %v1094_v32, 0.0 }
 0x121   : > { %v970_v62 = vadd.f32 %v969_v10, %v968_v8  ;;  %v1107_v22 = vadd.f32 %v1106_v36, %v1105_v11  ;;  %v1099_v47 = vrot.slane %v1098_v43, 2  ;;  %v1111_v5 = vrot.slane %v1110_v53, 4  ;;  %v2890_v25 = vpop.f32.mrb[24].mxu0 }
 0x122   : > { %3140 = vst [vmem:[#allocation17_spill] sm:$0xff] %v2890_v25  ;;  %v2892_v50 = vmul.f32 0.35355338, %v977_v46  ;;  %v1119_v57 = vadd.f32 %v1118_v39, %v1117_v49  ;;  %v1239_v14 = vmul.f32 %v2231_v38, %v2750_v1  ;;  %v1238_v17 = vmul.f32 %v1199_v51, %v2752_v4  ;;  %v2251_v35 = vpop.f32.mrb[24].mxu1  ;;  %v2896_v24 = vpop.f32.mrb[25].mxu0 }
 0x123   : > { %3141 = vst [vmem:[#allocation18_spill] sm:$0xff] %v2896_v24  ;;  %v2898_v16 = vmul.f32 0.35355338, %v970_v62  ;;  %v1108_v3 = vrot.slane %v1107_v22, 1  ;;  %v1100_v34 = vadd.f32 %v1099_v47, %v1098_v43  ;;  %v1112_v8 = vadd.f32 %v1111_v5, %v1110_v53  ;;  %v1345_v11 = vpop.f32.mrb[25].mxu1 }
 0x124   : > { %v1577_v32 = vmax.f32 %v2863_v55, %v2892_v50  ;;  %v1120_v10 = vrot.slane %v1119_v57, 2  ;;  %v1249_v36 = vsel %vm511_vm1, %v1239_v14, 0.0  ;;  %v1242_v49 = vsel %vm511_vm1, %v1238_v17, 0.0 }
 0x125   : > { %v1576_v38 = vmax.f32 %v2869_v52, %v2898_v16  ;;  %v1109_v51 = vadd.f32 %v1108_v3, %v1107_v22  ;;  %v1101_v46 = vrot.slane %v1100_v34, 1  ;;  %v1113_v39 = vrot.slane %v1112_v8, 2  ;;  %v2906_v62 = vpop.f32.mrb[26].mxu0 }
 0x126   : > { %3142 = vst [vmem:[#allocation19_spill] sm:$0xff] %v2906_v62  ;;  %v1121_v0 = vadd.f32 %v1120_v10, %v1119_v57  ;;  %v1250_v43 = vrot.slane %v1249_v36, 4  ;;  %v1243_v53 = vrot.slane %v1242_v49, 4  ;;  %v1241_v47 = vmul.f32 %v2234_v29, %v2757_v9  ;;  %v2254_v5 = vpop.f32.mrb[26].mxu1  ;;  %v2909_v55 = vpop.f32.mrb[27].mxu0 }
 0x127   : > { %3143 = vst [vmem:[#allocation20_spill] sm:$0xff] %v2909_v55  ;;  %v2911_v12 = vmul.f32 0.35355338, %v1109_v51  ;;  %v1102_v14 = vadd.f32 %v1101_v46, %v1100_v34  ;;  %v1114_v17 = vadd.f32 %v1113_v39, %v1112_v8  ;;  %v1240_v19 = vmul.f32 %v1209_v18, %v2760_v13  ;;  %v1355_v52 = vpop.f32.mrb[27].mxu1 }
 0x128   : > { %v1122_v22 = vrot.slane %v1121_v0, 1  ;;  %v1251_v3 = vadd.f32 %v1250_v43, %v1249_v36  ;;  %v1244_v45 = vadd.f32 %v1243_v53, %v1242_v49  ;;  %v1263_v62 = vsel %vm511_vm1, %v1241_v47, 0.0 }
 0x129   : > { %v2916_v57 = vmax.f32 %v1575_v28, %v2911_v12  ;;  %v2918_v10 = vmul.f32 0.35355338, %v1102_v14  ;;  %v1115_v29 = vrot.slane %v1114_v17, 1  ;;  %v1264_v24 = vrot.slane %v1263_v62, 4  ;;  %v2271_v55 = vpop.f32.mrb[28].mxu0 }
 0x12a   : > { %v1123_v51 = vadd.f32 %v1122_v22, %v1121_v0  ;;  %v1252_v63 = vrot.slane %v1251_v3, 2  ;;  %v1245_v34 = vrot.slane %v1244_v45, 2  ;;  %v1256_v8 = vsel %vm511_vm1, %v1240_v19, 0.0  ;;  %v1491_v18 = vpop.f32.mrb[29].mxu0  ;;  %v2921_v46 = vpop.f32.mrb[28].mxu1 }
 0x12b   : > { %3144 = vst [vmem:[#allocation21_spill] sm:$0xff] %v2921_v46  ;;  %v2924_v36 = vmax.f32 %v1574_v44, %v2918_v10  ;;  %v1116_v49 = vadd.f32 %v1115_v29, %v1114_v17  ;;  %v1265_v39 = vadd.f32 %v1264_v24, %v1263_v62  ;;  %v1257_v28 = vrot.slane %v1256_v8, 4  ;;  %v2926_v43 = vpop.f32.mrb[29].mxu1 }
 0x12c   : > { %3145 = vst [vmem:[#allocation22_spill] sm:$0xff] %v2926_v43  ;;  %v2928_v53 = vmul.f32 0.35355338, %v1123_v51  ;;  %v1253_v47 = vadd.f32 %v1252_v63, %v1251_v3  ;;  %v1246_v14 = vadd.f32 %v1245_v34, %v1244_v45  ;;  %v1385_v0 = vmul.f32 %v2251_v35, %v2750_v1 }
 0x12d   : > { %v2931_v22 = vmul.f32 0.35355338, %v1116_v49  ;;  %v1266_v19 = vrot.slane %v1265_v39, 2  ;;  %v1258_v40 = vadd.f32 %v1257_v28, %v1256_v8  ;;  %v1384_v54 = vmul.f32 %v1345_v11, %v2752_v4  ;;  %v2274_v7 = vpop.f32.mrb[30].mxu0 }
 0x12e   : > { %v2935_v44 = vmax.f32 %v1577_v32, %v2928_v53  ;;  %v1254_v24 = vrot.slane %v1253_v47, 1  ;;  %v1247_v62 = vrot.slane %v1246_v14, 1  ;;  %v1395_v17 = vsel %vm511_vm1, %v1385_v0, 0.0  ;;  %v1501_v29 = vpop.f32.mrb[31].mxu0  ;;  %v2938_v51 = vpop.f32.mrb[30].mxu1 }
 0x12f   : > { %3146 = vst [vmem:[#allocation23_spill] sm:$0xff] %v2938_v51  ;;  %v2941_v45 = vmax.f32 %v1576_v38, %v2931_v22  ;;  %v1267_v63 = vadd.f32 %v1266_v19, %v1265_v39  ;;  %v1259_v35 = vrot.slane %v1258_v40, 2  ;;  %v1396_v3 = vrot.slane %v1395_v17, 4  ;;  %v2943_v34 = vpop.f32.mrb[31].mxu1 }
 0x130   : > { %3147 = vst [vmem:[#allocation24_spill] sm:$0xff] %v2943_v34  ;;  %v1255_v11 = vadd.f32 %v1254_v24, %v1253_v47  ;;  %v1248_v8 = vadd.f32 %v1247_v62, %v1246_v14  ;;  %v1388_v32 = vsel %vm511_vm1, %v1384_v54, 0.0  ;;  %v1387_v49 = vmul.f32 %v2254_v5, %v2757_v9 }
 0x131   : > { %v1268_v28 = vrot.slane %v1267_v63, 1  ;;  %v1260_v43 = vadd.f32 %v1259_v35, %v1258_v40  ;;  %v1397_v0 = vadd.f32 %v1396_v3, %v1395_v17  ;;  %v1389_v31 = vrot.slane %v1388_v32, 4  ;;  %v2947_v46 = vpop.f32.mrb[32].mxu0 }
 0x132   : > { %v2949_v51 = vmul.f32 0.35355338, %v1255_v11  ;;  %v2951_v38 = vmul.f32 0.35355338, %v1248_v8  ;;  %v1409_v39 = vsel %vm511_vm1, %v1387_v49, 0.0  ;;  %v1386_v19 = vmul.f32 %v1355_v52, %v2760_v13  ;;  %v2955_v47 = vpop.f32.mrb[33].mxu0 }
 0x133   : > { %v1269_v14 = vadd.f32 %v1268_v28, %v1267_v63  ;;  %v1261_v54 = vrot.slane %v1260_v43, 1  ;;  %v1398_v24 = vrot.slane %v1397_v0, 2  ;;  %v1390_v5 = vadd.f32 %v1389_v31, %v1388_v32  ;;  %v2957_v62 = vpop.f32.mrb[32].mxu1 }
 0x134   : > { %3148 = vst [vmem:[#allocation25_spill] sm:$0xff] %v2957_v62  ;;  %v1583_v40 = vmax.f32 %v2916_v57, %v2949_v51  ;;  %v1582_v17 = vmax.f32 %v2924_v36, %v2951_v38  ;;  %v1410_v35 = vrot.slane %v1409_v39, 4  ;;  %v1402_v3 = vsel %vm511_vm1, %v1386_v19, 0.0  ;;  %v2964_v11 = vpop.f32.mrb[33].mxu1 }
 0x135   : > { %3149 = vst [vmem:[#allocation26_spill] sm:$0xff] %v2964_v11  ;;  %v2966_v52 = vmul.f32 0.35355338, %v1269_v14  ;;  %v1262_v8 = vadd.f32 %v1261_v54, %v1260_v43  ;;  %v1399_v63 = vadd.f32 %v1398_v24, %v1397_v0  ;;  %v1391_v49 = vrot.slane %v1390_v5, 2 }
 0x136   : > { %v1411_v28 = vadd.f32 %v1410_v35, %v1409_v39  ;;  %v1403_v31 = vrot.slane %v1402_v3, 4  ;;  %v1531_v32 = vmul.f32 %v2271_v55, %v2750_v1  ;;  %v1530_v34 = vmul.f32 %v1491_v18, %v2752_v4 }
 0x137   : > { %v1585_v57 = vmax.f32 %v2935_v44, %v2966_v52  ;;  %v2972_v36 = vmul.f32 0.35355338, %v1262_v8  ;;  %v1400_v62 = vrot.slane %v1399_v63, 1  ;;  %v1392_v19 = vadd.f32 %v1391_v49, %v1390_v5 }
 0x138   : > { %v1412_v25 = vrot.slane %v1411_v28, 2  ;;  %v1404_v11 = vadd.f32 %v1403_v31, %v1402_v3  ;;  %v1541_v14 = vsel %vm511_vm1, %v1531_v32, 0.0  ;;  %v1534_v43 = vsel %vm511_vm1, %v1530_v34, 0.0 }
 0x139   : > { %v1584_v0 = vmax.f32 %v2941_v45, %v2972_v36  ;;  %v1401_v39 = vadd.f32 %v1400_v62, %v1399_v63  ;;  %v1393_v1 = vrot.slane %v1392_v19, 1  ;;  %v1542_v55 = vrot.slane %v1541_v14, 4 }
 0x13a   : > { %v1413_v4 = vadd.f32 %v1412_v25, %v1411_v28  ;;  %v1405_v18 = vrot.slane %v1404_v11, 2  ;;  %v1535_v54 = vrot.slane %v1534_v43, 4  ;;  %v1533_v44 = vmul.f32 %v2274_v7, %v2757_v9 }
 0x13b   : > { %v2979_v24 = vmul.f32 0.35355338, %v1401_v39  ;;  %v1394_v5 = vadd.f32 %v1393_v1, %v1392_v19  ;;  %v1543_v35 = vadd.f32 %v1542_v55, %v1541_v14  ;;  %v1532_v3 = vmul.f32 %v1501_v29, %v2760_v13 }
 0x13c   : > { %v1414_v8 = vrot.slane %v1413_v4, 1  ;;  %v1406_v49 = vadd.f32 %v1405_v18, %v1404_v11  ;;  %v1536_v34 = vadd.f32 %v1535_v54, %v1534_v43  ;;  %v1555_v31 = vsel %vm511_vm1, %v1533_v44, 0.0 }
 0x13d   : > { %v1587_v45 = vmax.f32 %v1583_v40, %v2979_v24  ;;  %v2984_v62 = vmul.f32 0.35355338, %v1394_v5  ;;  %v1544_v25 = vrot.slane %v1543_v35, 2  ;;  %v1556_v63 = vrot.slane %v1555_v31, 4 }
 0x13e   : > { %v1415_v28 = vadd.f32 %v1414_v8, %v1413_v4  ;;  %v1407_v32 = vrot.slane %v1406_v49, 1  ;;  %v1537_v9 = vrot.slane %v1536_v34, 2  ;;  %v1548_v7 = vsel %vm511_vm1, %v1532_v3, 0.0 }
 0x13f   : > { %v1586_v19 = vmax.f32 %v1582_v17, %v2984_v62  ;;  %v1545_v14 = vadd.f32 %v1544_v25, %v1543_v35  ;;  %v1557_v13 = vadd.f32 %v1556_v63, %v1555_v31  ;;  %v1549_v29 = vrot.slane %v1548_v7, 4 }
 0x140   : > { %v2988_v11 = vmul.f32 0.35355338, %v1415_v28  ;;  %v1408_v43 = vadd.f32 %v1407_v32, %v1406_v49  ;;  %v1538_v39 = vadd.f32 %v1537_v9, %v1536_v34 }
 0x141   : > { %v1546_v1 = vrot.slane %v1545_v14, 1  ;;  %v1558_v40 = vrot.slane %v1557_v13, 2  ;;  %v1550_v55 = vadd.f32 %v1549_v29, %v1548_v7 }
 0x142   : > { %v1589_v18 = vmax.f32 %v1585_v57, %v2988_v11  ;;  %v2991_v54 = vmul.f32 0.35355338, %v1408_v43  ;;  %v1539_v4 = vrot.slane %v1538_v39, 1 }
 0x143   : > { %v1547_v44 = vadd.f32 %v1546_v1, %v1545_v14  ;;  %v1559_v5 = vadd.f32 %v1558_v40, %v1557_v13  ;;  %v1551_v3 = vrot.slane %v1550_v55, 2 }
 0x144   : > { %v1588_v17 = vmax.f32 %v1584_v0, %v2991_v54  ;;  %v1540_v35 = vadd.f32 %v1539_v4, %v1538_v39 }
 0x145   : > { %v1563_v8 = vmul.f32 0.35355338, %v1547_v44  ;;  %v1560_v31 = vrot.slane %v1559_v5, 1  ;;  %v1552_v25 = vadd.f32 %v1551_v3, %v1550_v55 }
 0x146   : > { %v1562_v63 = vmul.f32 0.35355338, %v1540_v35 }
 0x147   : > { %v1591_v49 = vmax.f32 %v1587_v45, %v1563_v8  ;;  %v1561_v34 = vadd.f32 %v1560_v31, %v1559_v5  ;;  %v1553_v28 = vrot.slane %v1552_v25, 1 }
 0x148   : > { %v1590_v32 = vmax.f32 %v1586_v19, %v1562_v63 }
 0x149   : > { %v1679_v9 = vsub.f32 %v1563_v8, %v1591_v49  ;;  %v1565_v7 = vmul.f32 0.35355338, %v1561_v34  ;;  %v1554_v57 = vadd.f32 %v1553_v28, %v1552_v25  ;;  %v1595_v29 = vsub.f32 %v2783_v60, %v1591_v49 }
 0x14a   : > { %v1678_v43 = vsub.f32 %v1562_v63, %v1590_v32  ;;  %v1607_v14 = vsub.f32 %v2803_v37, %v1591_v49  ;;  %v1619_v13 = vsub.f32 %v2839_v41, %v1591_v49  ;;  %v1631_v0 = vsub.f32 %v2875_v6, %v1591_v49 }
 0x14b   : > { %v1684_v39 = vmul.f32 1.442695, %v1679_v9  ;;  %v2998_v1 = vmax.f32 %v1589_v18, %v1565_v7  ;;  %v1564_v40 = vmul.f32 0.35355338, %v1554_v57  ;;  %v1600_v45 = vmul.f32 1.442695, %v1595_v29 }
 0x14c   : > { %v1682_v55 = vmul.f32 1.442695, %v1678_v43  ;;  %v1612_v4 = vmul.f32 1.442695, %v1607_v14  ;;  %v1624_v19 = vmul.f32 1.442695, %v1619_v13  ;;  %v1643_v44 = vsub.f32 %v2911_v12, %v1591_v49 }
 0x14d   : > { %2381 = vpow2.f32 %v1684_v39  ;;  %v1681_v60 = vsub.f32 %v1565_v7, %v2998_v1  ;;  %v3002_v5 = vmax.f32 %v1588_v17, %v1564_v40  ;;  %v1636_v37 = vmul.f32 1.442695, %v1631_v0 }
 0x14e   : > { %2383 = vpow2.f32 %v1682_v55  ;;  %v1648_v41 = vmul.f32 1.442695, %v1643_v44  ;;  %v1655_v6 = vsub.f32 %v2949_v51, %v1591_v49  ;;  %v1667_v18 = vsub.f32 %v2979_v24, %v1591_v49 }
 0x14f   : > { %v1688_v3 = vmul.f32 1.442695, %v1681_v60  ;;  %v1680_v35 = vsub.f32 %v1564_v40, %v3002_v5  ;;  %2385 = vpow2.f32 %v1600_v45  ;;  %v1594_v8 = vsub.f32 %v2786_v2, %v1590_v32 }
 0x150   : > { %2387 = vpow2.f32 %v1612_v4  ;;  %v1660_v12 = vmul.f32 1.442695, %v1655_v6  ;;  %v1672_v31 = vmul.f32 1.442695, %v1667_v18  ;;  %v1606_v25 = vsub.f32 %v2805_v42, %v1590_v32 }
 0x151   : > { %2389 = vpow2.f32 %v1688_v3  ;;  %v1686_v17 = vmul.f32 1.442695, %v1680_v35  ;;  %v1598_v63 = vmul.f32 1.442695, %v1594_v8  ;;  %v1618_v34 = vsub.f32 %v2846_v58, %v1590_v32 }
 0x152   : > { %2391 = vpow2.f32 %v1624_v19  ;;  %v1610_v51 = vmul.f32 1.442695, %v1606_v25  ;;  %v1630_v24 = vsub.f32 %v2877_v15, %v1590_v32  ;;  %v1642_v49 = vsub.f32 %v2918_v10, %v1590_v32 }
 0x153   : > { %2393 = vpow2.f32 %v1686_v17  ;;  %v1622_v28 = vmul.f32 1.442695, %v1618_v34  ;;  %v1654_v2 = vsub.f32 %v2951_v38, %v1590_v32  ;;  %v1666_v9 = vsub.f32 %v2984_v62, %v1590_v32 }
 0x154   : > { %2395 = vpow2.f32 %v1636_v37  ;;  %v1634_v7 = vmul.f32 1.442695, %v1630_v24  ;;  %v1646_v42 = vmul.f32 1.442695, %v1642_v49  ;;  %v1597_v57 = vsub.f32 %v2794_v20, %v2998_v1 }
 0x155   : > { %2397 = vpow2.f32 %v1648_v41  ;;  %v1658_v58 = vmul.f32 1.442695, %v1654_v2  ;;  %v1670_v29 = vmul.f32 1.442695, %v1666_v9  ;;  %v1609_v15 = vsub.f32 %v2818_v61, %v2998_v1 }
 0x156   : > { %2399 = vpow2.f32 %v1660_v12  ;;  %v1604_v10 = vmul.f32 1.442695, %v1597_v57  ;;  %v1621_v43 = vsub.f32 %v2856_v23, %v2998_v1  ;;  %v1633_v38 = vsub.f32 %v2892_v50, %v2998_v1  ;;  %v3152_v57 = vld [vmem:[#allocation2_spill] sm:$0xff] }
 0x157   : > { %v3022_v62 = vpop.eup %2381  ;;  %2401 = vpow2.f32 %v1672_v31  ;;  %v1616_v32 = vmul.f32 1.442695, %v1609_v15  ;;  %v1645_v20 = vsub.f32 %v2928_v53, %v2998_v1  ;;  %v1657_v14 = vsub.f32 %v2966_v52, %v2998_v1 }
 0x158   : > { %v3028_v13 = vpop.eup %2383  ;;  %v3032_v61 = vmul.f32 %v3022_v62, %v2947_v46  ;;  %2403 = vpow2.f32 %v1598_v63  ;;  %v1628_v23 = vmul.f32 1.442695, %v1621_v43  ;;  %v1640_v0 = vmul.f32 1.442695, %v1633_v38 }
 0x159   : > { %v2386_v50 = vpop.eup %2385  ;;  %2405 = vpow2.f32 %v1610_v51  ;;  %v3036_v39 = vmul.f32 %v3028_v13, %v2955_v47  ;;  %v1652_v40 = vmul.f32 1.442695, %v1645_v20  ;;  %v1664_v53 = vmul.f32 1.442695, %v1657_v14  ;;  %v3150_v51 = vld [vmem:[#allocation17_spill] sm:$0xff]  ;;  %v3154_v14 = vld [vmem:[#allocation8_spill] sm:$0xff] }
 0x15a   : > { %v2388_v45 = vpop.eup %2387  ;;  %v1723_v52 = vmul.f32 %v2386_v50, %v2767_v27  ;;  %2407 = vpow2.f32 %v1622_v28  ;;  %v1669_v55 = vsub.f32 %v2988_v11, %v2998_v1  ;;  %v1596_v46 = vsub.f32 %v2799_v26, %v3002_v5  ;;  %v3151_v28 = vld [vmem:[#allocation21_spill] sm:$0xff] }
 0x15b   : > { %v3043_v4 = vpop.eup %2389  ;;  %v1727_v19 = vmul.f32 %v2388_v45, %v2781_v59  ;;  %v1691_v44 = vadd.f32 %v2388_v45, %v2386_v50  ;;  %2409 = vpow2.f32 %v1634_v7  ;;  %v1608_v47 = vsub.f32 %v2828_v21, %v3002_v5  ;;  %v3155_v50 = vld [vmem:[#allocation11_spill] sm:$0xff] }
 0x15c   : > { %v2392_v60 = vpop.eup %2391  ;;  %2411 = vpow2.f32 %v1646_v42  ;;  %v1676_v37 = vmul.f32 1.442695, %v1669_v55  ;;  %v1602_v27 = vmul.f32 1.442695, %v1596_v46  ;;  %v1620_v41 = vsub.f32 %v2859_v30, %v3002_v5 }
 0x15d   : > { %v3050_v11 = vpop.eup %2393  ;;  %v1731_v1 = vadd.f32 %v1727_v19, %v1723_v52  ;;  %v1735_v26 = vmul.f32 %v2392_v60, %v2809_v48  ;;  %v1695_v6 = vadd.f32 %v2392_v60, %v1691_v44  ;;  %2413 = vpow2.f32 %v1658_v58  ;;  %v3156_v19 = vld [vmem:[#allocation14_spill] sm:$0xff] }
 0x15e   : > { %v2396_v59 = vpop.eup %2395  ;;  %2415 = vpow2.f32 %v1670_v29  ;;  %v1614_v18 = vmul.f32 1.442695, %v1608_v47  ;;  %v1626_v3 = vmul.f32 1.442695, %v1620_v41  ;;  %v1632_v21 = vsub.f32 %v2898_v16, %v3002_v5  ;;  %v3153_v29 = vld [vmem:[#allocation5_spill] sm:$0xff]  ;;  %v3157_v60 = vld [vmem:[#allocation18_spill] sm:$0xff] }
 0x15f   : > { %v2398_v35 = vpop.eup %2397  ;;  %v1739_v8 = vadd.f32 %v1735_v26, %v1731_v1  ;;  %v1743_v12 = vmul.f32 %v2396_v59, %v2832_v33  ;;  %v1699_v31 = vadd.f32 %v2396_v59, %v1695_v6  ;;  %2417 = vpow2.f32 %v1604_v10  ;;  %v3158_v6 = vld [vmem:[#allocation22_spill] sm:$0xff] }
 0x160   : > { %v2400_v30 = vpop.eup %2399  ;;  %v1751_v25 = vmul.f32 %v2398_v35, %v2866_v56  ;;  %2419 = vpow2.f32 %v1616_v32  ;;  %v1638_v48 = vmul.f32 1.442695, %v1632_v21  ;;  %v1644_v17 = vsub.f32 %v2931_v22, %v3002_v5 }
 0x161   : > { %v2402_v63 = vpop.eup %2401  ;;  %v1747_v34 = vadd.f32 %v1743_v12, %v1739_v8  ;;  %v1759_v24 = vmul.f32 %v2400_v30, %v3150_v51  ;;  %v1703_v49 = vadd.f32 %v2398_v35, %v1699_v31  ;;  %2421 = vpow2.f32 %v1628_v23  ;;  %v3159_v8 = vld [vmem:[#allocation3_spill] sm:$0xff]  ;;  %v3160_v31 = vld [vmem:[#allocation6_spill] sm:$0xff] }
 0x162   : > { %v2404_v16 = vpop.eup %2403  ;;  %v1767_v2 = vmul.f32 %v2402_v63, %v3151_v28  ;;  %2423 = vpow2.f32 %v1640_v0  ;;  %v1650_v33 = vmul.f32 1.442695, %v1644_v17  ;;  %v1656_v9 = vsub.f32 %v2972_v36, %v3002_v5 }
 0x163   : > { %v2406_v56 = vpop.eup %2405  ;;  %v1755_v7 = vadd.f32 %v1751_v25, %v1747_v34  ;;  %v1707_v42 = vadd.f32 %v2400_v30, %v1703_v49  ;;  %v1722_v58 = vmul.f32 %v2404_v16, %v3152_v57  ;;  %2425 = vpow2.f32 %v1652_v40  ;;  %v3161_v34 = vld [vmem:[#allocation9_spill] sm:$0xff] }
 0x164   : > { %v2408_v22 = vpop.eup %2407  ;;  %v1726_v15 = vmul.f32 %v2406_v56, %v3153_v29  ;;  %v1690_v10 = vadd.f32 %v2406_v56, %v2404_v16  ;;  %2427 = vpow2.f32 %v1664_v53  ;;  %v1662_v43 = vmul.f32 1.442695, %v1656_v9  ;;  %v3163_v9 = vld [vmem:[#allocation15_spill] sm:$0xff] }
 0x165   : > { %v2410_v38 = vpop.eup %2409  ;;  %v1763_v32 = vadd.f32 %v1759_v24, %v1755_v7  ;;  %v1711_v20 = vadd.f32 %v2402_v63, %v1707_v42  ;;  %v1734_v23 = vmul.f32 %v2408_v22, %v3154_v14  ;;  %2429 = vpow2.f32 %v1676_v37 }
 0x166   : > { %v2412_v0 = vpop.eup %2411  ;;  %v1730_v36 = vadd.f32 %v1726_v15, %v1722_v58  ;;  %v1742_v45 = vmul.f32 %v2410_v38, %v3155_v50  ;;  %v1694_v52 = vadd.f32 %v2408_v22, %v1690_v10  ;;  %2431 = vpow2.f32 %v1602_v27  ;;  %v3165_v58 = vld [vmem:[#allocation19_spill] sm:$0xff]  ;;  %v3166_v15 = vld [vmem:[#allocation26_spill] sm:$0xff] }
 0x167   : > { %v2414_v55 = vpop.eup %2413  ;;  %v1771_v40 = vadd.f32 %v1767_v2, %v1763_v32  ;;  %v1715_v46 = vadd.f32 %v3022_v62, %v1711_v20  ;;  %v1750_v44 = vmul.f32 %v2412_v0, %v3156_v19  ;;  %2433 = vpow2.f32 %v1614_v18  ;;  %v3167_v20 = vld [vmem:[#allocation23_spill] sm:$0xff] }
 0x168   : > { %v2416_v53 = vpop.eup %2415  ;;  %v1738_v47 = vadd.f32 %v1734_v23, %v1730_v36  ;;  %v1758_v41 = vmul.f32 %v2414_v55, %v3157_v60  ;;  %v1698_v1 = vadd.f32 %v2410_v38, %v1694_v52  ;;  %2435 = vpow2.f32 %v1626_v3  ;;  %v3168_v36 = vld [vmem:[#allocation4_spill] sm:$0xff] }
 0x169   : > { %v2418_v37 = vpop.eup %2417  ;;  %2437 = vrcp.f32 %v1715_v46  ;;  %v1779_v26 = vadd.f32 %v3032_v61, %v1771_v40  ;;  %v1766_v59 = vmul.f32 %v2416_v53, %v3158_v6  ;;  %v1668_v27 = vsub.f32 %v2991_v54, %v3002_v5  ;;  %v3162_v5 = vld [vmem:[#allocation12_spill] sm:$0xff]  ;;  %v3169_v40 = vld [vmem:[#allocation7_spill] sm:$0xff] }
 0x16a   : > { %v2420_v21 = vpop.eup %2419  ;;  %v1746_v62 = vadd.f32 %v1742_v45, %v1738_v47  ;;  %v1702_v35 = vadd.f32 %v2412_v0, %v1698_v1  ;;  %v1725_v18 = vmul.f32 %v2418_v37, %v3159_v8  ;;  %2439 = vpow2.f32 %v1638_v48 }
 0x16b   : > { %v2422_v12 = vpop.eup %2421  ;;  %v1729_v30 = vmul.f32 %v2420_v21, %v3160_v31  ;;  %2441 = vpow2.f32 %v1650_v33  ;;  %v1674_v3 = vmul.f32 1.442695, %v1668_v27  ;;  %v1693_v25 = vadd.f32 %v2420_v21, %v2418_v37  ;;  %v3164_v33 = vld [vmem:[#allocation25_spill] sm:$0xff] }
 0x16c   : > { %v2424_v17 = vpop.eup %2423  ;;  %v1754_v63 = vadd.f32 %v1750_v44, %v1746_v62  ;;  %v1706_v61 = vadd.f32 %v2414_v55, %v1702_v35  ;;  %v1737_v51 = vmul.f32 %v2422_v12, %v3161_v34  ;;  %2443 = vpow2.f32 %v1662_v43  ;;  %v3171_v27 = vld [vmem:[#allocation13_spill] sm:$0xff] }
 0x16d   : > { %v2426_v24 = vpop.eup %2425  ;;  %v1733_v54 = vadd.f32 %v1729_v30, %v1725_v18  ;;  %v1745_v49 = vmul.f32 %v2424_v17, %v3162_v5  ;;  %2445 = vpow2.f32 %v1674_v3  ;;  %v1697_v16 = vadd.f32 %v2422_v12, %v1693_v25  ;;  %v3172_v18 = vld [vmem:[#allocation16_spill] sm:$0xff] }
 0x16e   : > { %v2428_v28 = vpop.eup %2427  ;;  %v1762_v48 = vadd.f32 %v1758_v41, %v1754_v63  ;;  %v1710_v2 = vadd.f32 %v2416_v53, %v1706_v61  ;;  %v1753_v56 = vmul.f32 %v2426_v24, %v3163_v9  ;;  %v1777_v7 = vmul.f32 %v3043_v4, %v3164_v33  ;;  %v3170_v53 = vld [vmem:[#allocation10_spill] sm:$0xff]  ;;  %v3173_v25 = vld [vmem:[#allocation20_spill] sm:$0xff] }
 0x16f   : > { %v2430_v42 = vpop.eup %2429  ;;  %v1741_v57 = vadd.f32 %v1737_v51, %v1733_v54  ;;  %v1761_v22 = vmul.f32 %v2428_v28, %v3165_v58  ;;  %v1701_v29 = vadd.f32 %v2424_v17, %v1697_v16  ;;  %v1776_v10 = vmul.f32 %v3050_v11, %v3166_v15  ;;  %v3174_v61 = vld [vmem:[#allocation24_spill] sm:$0xff] }
 0x170   : > { %v2432_v43 = vpop.eup %2431  ;;  %v1770_v38 = vadd.f32 %v1766_v59, %v1762_v48  ;;  %v1714_v32 = vadd.f32 %v3028_v13, %v1710_v2  ;;  %v1769_v14 = vmul.f32 %v2430_v42, %v3167_v20 }
 0x171   : > { %v2434_v23 = vpop.eup %2433  ;;  %v1749_v0 = vadd.f32 %v1745_v49, %v1741_v57  ;;  %v1724_v50 = vmul.f32 %v2432_v43, %v3168_v36  ;;  %v1705_v45 = vadd.f32 %v2426_v24, %v1701_v29 }
 0x172   : > { %v2436_v52 = vpop.eup %2435  ;;  %2447 = vrcp.f32 %v1714_v32  ;;  %v1778_v55 = vadd.f32 %v3036_v39, %v1770_v38  ;;  %v1728_v46 = vmul.f32 %v2434_v23, %v3169_v40  ;;  %v1692_v19 = vadd.f32 %v2434_v23, %v2432_v43 }
 0x173   : > { %v2438_v44 = vpop.eup %2437  ;;  %v1757_v13 = vadd.f32 %v1753_v56, %v1749_v0  ;;  %v1736_v47 = vmul.f32 %v2436_v52, %v3170_v53  ;;  %v1709_v60 = vadd.f32 %v2428_v28, %v1705_v45 }
 0x174   : > { %v2440_v41 = vpop.eup %2439  ;;  %v1783_v1 = vmul.f32 %v2438_v44, %v1779_v26  ;;  %v1732_v37 = vadd.f32 %v1728_v46, %v1724_v50  ;;  %v1696_v6 = vadd.f32 %v2436_v52, %v1692_v19 }
 0x175   : > { %v2442_v39 = vpop.eup %2441  ;;  %v1765_v59 = vadd.f32 %v1761_v22, %v1757_v13  ;;  %v1744_v21 = vmul.f32 %v2440_v41, %v3171_v27  ;;  %v1713_v62 = vadd.f32 %v2430_v42, %v1709_v60 }
 0x176   : > { %v2444_v35 = vpop.eup %2443  ;;  %1787 = vst.msk [vmem:[%s3094_s6 + $0x8] sm:$0xff] %vm511_vm1, %v1783_v1  ;;  %v1740_v8 = vadd.f32 %v1736_v47, %v1732_v37  ;;  %v1752_v12 = vmul.f32 %v2442_v39, %v3172_v18  ;;  %v1700_v31 = vadd.f32 %v2440_v41, %v1696_v6 }
 0x177   : > { %v2446_v30 = vpop.eup %2445  ;;  %v1773_v3 = vadd.f32 %v1769_v14, %v1765_v59  ;;  %v1760_v17 = vmul.f32 %v2444_v35, %v3173_v25  ;;  %v1717_v26 = vadd.f32 %v3043_v4, %v1713_v62 }
 0x178   : > { %v1748_v63 = vadd.f32 %v1744_v21, %v1740_v8  ;;  %v1768_v34 = vmul.f32 %v2446_v30, %v3174_v61  ;;  %v1704_v51 = vadd.f32 %v2442_v39, %v1700_v31 }
 0x179   : > { %2449 = vrcp.f32 %v1717_v26  ;;  %v1781_v24 = vadd.f32 %v1777_v7, %v1773_v3 }
 0x17a   : > { %v1756_v54 = vadd.f32 %v1752_v12, %v1748_v63  ;;  %v1708_v5 = vadd.f32 %v2444_v35, %v1704_v51 }
 0x17c   : > { %v2448_v49 = vpop.eup %2447  ;;  %v1764_v16 = vadd.f32 %v1760_v17, %v1756_v54  ;;  %v1712_v28 = vadd.f32 %v2446_v30, %v1708_v5 }
 0x17d   : > { %v1782_v48 = vmul.f32 %v2448_v49, %v1778_v55 }
 0x17e   : > { %v1772_v2 = vadd.f32 %v1768_v34, %v1764_v16  ;;  %v1716_v9 = vadd.f32 %v3050_v11, %v1712_v28 }
 0x17f   : > { %1786 = vst.msk [vmem:[%s3094_s6] sm:$0xff] %vm511_vm1, %v1782_v48 }
 0x180   : > { %2451 = vrcp.f32 %v1716_v9  ;;  %v1780_v4 = vadd.f32 %v1776_v10, %v1772_v2 }
 0x183   : > { %v2450_v56 = vpop.eup %2449 }
 0x184   : > { %v1785_v33 = vmul.f32 %v2450_v56, %v1781_v24 }
 0x186   : > { %1789 = vst.msk [vmem:[%s3094_s6 + $0x18] sm:$0xff] %vm511_vm1, %v1785_v33 }
 0x18a   : > { %v2452_v42 = vpop.eup %2451 }
 0x18b   : > { %v1784_v7 = vmul.f32 %v2452_v42, %v1780_v4 }
 0x18d   : > { %1788 = vst.msk [vmem:[%s3094_s6 + $0x10] sm:$0xff] %vm511_vm1, %v1784_v7 }
 0x18e PF: > { %s14_s17 = sadd.s32 1, %s2475_s17   ;;  %s3175_s15 = smov %s2471_s16 }
 0x18f   : > { %p11_p5 = scmp.ge.s32.totalorder %s14_s17, 4   ;;  %s3176_s16 = smov %s3178_s18 }
 0x191   :  { %13 = sbr.rel (!%p11_p5) target bundleno = 2 (0x2), region = 76 }

</bundles_post_ra>
